<compile_context>
chip_gen: v6e
topology: v6e:2x2x1
jax: 0.10.0
libtpu: 0.0.40
codegen_flags: <defaults>
</compile_context>

<pallas_src>
import jax
import jax.numpy as jnp
from jax import lax
from jax.experimental import pallas as pl
from jax.experimental.pallas import tpu as pltpu


def _round_up(x, m):
    return (x + m - 1) // m * m


def _reorder_pad_gates(w, H, Hp, row_pad):
    """(rows, 4H) in PyTorch gate order (i,f,g,o) -> (rows+row_pad, 4*Hp) in (i,f,o,g)."""
    blocks = [w[:, k * H:(k + 1) * H] for k in (0, 1, 3, 2)]          # i, f, o, g
    blocks = [jnp.pad(blk, ((0, row_pad), (0, Hp - H))) for blk in blocks]
    return jnp.concatenate(blocks, axis=1)


def lstm_kernel(maxlen_ref, x_ref, lens_ref, wih_ref, whh_ref, b_ref,
                wd_ref, bd_ref, out_ref, h_scr, c_scr, pre_scr):
    """x_ref: (T*Bp, Ep) bf16 chunk (rows grouped time-major), lens_ref: (Bp, Hp) i32,
    wih: (Ep, 4Hp) bf16, whh: (Hp, 4Hp) bf16, b: (T*Bp, 4Hp) f32 (pre-broadcast),
    wd: (Hp, Pp) bf16, bd: (Bp, Pp) f32, out: (Bp, Pp) f32.  Gate order (i, f, o, g)."""
    TB, _ = x_ref.shape
    Bp, Hp = c_scr.shape
    T = TB // Bp                                   # time steps per chunk (static)
    chunk = pl.program_id(0)
    t0 = chunk * T

    @pl.when(chunk == 0)
    def _init():
        h_scr[...] = jnp.zeros_like(h_scr)
        c_scr[...] = jnp.zeros_like(c_scr)

    # Skip chunks lying entirely in the padded tail (their x DMA is also suppressed
    # by the clamped index_map in the wrapper).
    @pl.when(t0 < maxlen_ref[0])
    def _run_chunk():
        # Phase 1: hoisted input projection for the whole chunk — one MXU matmul
        # (T*Bp, Ep) @ (Ep, 4Hp) with f32 accumulation.  Bias is already broadcast
        # to (T*Bp, 4Hp) wrapper-side, so this is a plain elementwise add.
        pre_scr[...] = (jnp.dot(x_ref[...], wih_ref[...],
                                preferred_element_type=jnp.float32)
                        + b_ref[...])
        lens = lens_ref[...]                       # (Bp, Hp) i32, pre-broadcast
        h_bf = h_scr[...]                          # bf16 carried state (MXU operand)
        c = c_scr[...]                             # f32 cell state

        def cell(pre, h_bf, c, t_abs):
            gates = pre + jnp.dot(h_bf, whh_ref[...],
                                  preferred_element_type=jnp.float32)  # (Bp, 4Hp) f32
            # sigmoid(x) = 0.5*tanh(0.5x) + 0.5: one EUP tanh covers i, f, o at once.
            sig = 0.5 * jnp.tanh(0.5 * gates[:, :3 * Hp]) + 0.5
            i_g = sig[:, 0 * Hp:1 * Hp]
            f_g = sig[:, 1 * Hp:2 * Hp]
            o_g = sig[:, 2 * Hp:3 * Hp]
            g_g = jnp.tanh(gates[:, 3 * Hp:])
            c_new = f_g * c + i_g * g_g
            h_new = o_g * jnp.tanh(c_new)
            # Emulate pack_padded_sequence / h_n: only update state while t < len(b).
            valid = lens > t_abs                                      # (Bp, Hp) bool
            c = jnp.where(valid, c_new, c)
            h_bf = jnp.where(valid, h_new.astype(jnp.bfloat16), h_bf)
            return h_bf, c

        # Phase 2: serial recurrence over the chunk.
        if T <= 8:
            # Short chunk: static unroll gives the scheduler the whole window.
            for i in range(T):
                h_bf, c = cell(pre_scr[i * Bp:(i + 1) * Bp, :], h_bf, c, t0 + i)
        else:
            # Long chunk: bounded live ranges (64 vregs); modest unroll keeps a
            # scheduling window without spills.
            def body(i, carry):
                h_bf, c = carry
                row = pl.multiple_of(i * Bp, 8)
                return cell(pre_scr[pl.ds(row, Bp), :], h_bf, c, t0 + i)
            h_bf, c = lax.fori_loop(0, T, body, (h_bf, c), unroll=4)

        h_scr[...] = h_bf
        c_scr[...] = c

    # Final dense on h_n.  NOTE: constant output block index + "arbitrary" axis =>
    # this single conditional write is flushed to HBM once at grid end.
    @pl.when(chunk == pl.num_programs(0) - 1)
    def _final():
        out_ref[...] = (jnp.dot(h_scr[...], wd_ref[...],
                                preferred_element_type=jnp.float32) + bd_ref[...])


def lstm_forward(text, embedding_matrix, params, *, t_chunk=None):
    """text: (B, S) int32 token ids (0 = pad).  Returns (B, P) logits."""
    B, S = text.shape
    E = embedding_matrix.shape[1]
    H = params["w_hh"].shape[0]
    P = params["w_dense"].shape[1]

    if t_chunk is None:
        # Single grid step for short sequences; 32-step chunks for long ones
        # (amortizes ~0.35 us/grid-step and makes the x@W_ih matmul LHS tall).
        t_chunk = S if S <= 32 else 32

    Bp = _round_up(max(B, 8), 8)       # sublane-aligned batch
    Ep = _round_up(E, 128)             # lane-aligned embed dim
    Hp = _round_up(H, 128)             # lane-aligned hidden dim
    Pp = _round_up(P, 128)             # lane-dense output
    Sp = _round_up(S, t_chunk)
    n_chunks = Sp // t_chunk

    # ---- plain-JAX glue: embedding lookup (gather) + length computation ----------
    x = embedding_matrix[text].astype(jnp.float32)              # (B, S, E)
    x_len = jnp.sum(text != 0, axis=-1).astype(jnp.int32)       # (B,)
    max_len = jnp.max(x_len).reshape(1).astype(jnp.int32)       # scalar-prefetch operand

    # Time-major, zero-padded, flattened to (Sp*Bp, Ep): row index = t*Bp + b, so a
    # time-chunk is one contiguous, lane/sublane-aligned block.  bf16 MXU operand.
    x_tm = jnp.transpose(x, (1, 0, 2))                          # (S, B, E)
    x_tm = jnp.pad(x_tm, ((0, Sp - S), (0, Bp - B), (0, Ep - E)))
    x_flat = x_tm.reshape(Sp * Bp, Ep).astype(jnp.bfloat16)

    # Lengths pre-broadcast to (Bp, Hp) so the per-step mask needs no broadcast.
    lens = jnp.pad(x_len, (0, Bp - B))
    lens = jnp.broadcast_to(lens[:, None], (Bp, Hp)).astype(jnp.int32)

    # Gate weights: reorder (i,f,g,o) -> (i,f,o,g), zero-pad each gate block to Hp.
    w_ih = _reorder_pad_gates(params["w_ih"], H, Hp, Ep - E).astype(jnp.bfloat16)
    w_hh = _reorder_pad_gates(params["w_hh"], H, Hp, Hp - H).astype(jnp.bfloat16)
    bias_row = _reorder_pad_gates((params["b_ih"] + params["b_hh"])[None, :],
                                  H, Hp, 0).astype(jnp.float32)        # (1, 4Hp)
    # Pre-broadcast to the full chunk shape: phase-1 add is then a plain VALU add
    # (no per-chunk sublane broadcast), and the block is DMA'd once (constant idx).
    bias = jnp.broadcast_to(bias_row, (t_chunk * Bp, 4 * Hp))

    # bf16 MXU operand for the final dense (single MXU pass on v5e), f32 accumulate.
    w_d = jnp.pad(params["w_dense"], ((0, Hp - H), (0, Pp - P))).astype(jnp.bfloat16)
    b_d = jnp.broadcast_to(jnp.pad(params["b_dense"], (0, Pp - P))[None, :],
                           (Bp, Pp)).astype(jnp.float32)

    def inv(shape):
        # Grid-invariant operand: constant block index + single buffer (no point in
        # double-buffering something that is fetched exactly once).
        return pl.BlockSpec(shape, lambda c, ml: (0, 0), pipeline_mode=pl.Buffered(1))

    def x_index_map(c, ml):
        # Clamp to the last non-padded chunk so fully-padded tail chunks re-request
        # the previous block and Pallas skips their HBM->VMEM DMA entirely.
        last = jnp.maximum(pl.cdiv(ml[0], t_chunk) - 1, 0)
        return (jnp.minimum(c, last), 0)

    grid_spec = pltpu.PrefetchScalarGridSpec(
        num_scalar_prefetch=1,                                   # max_len -> SMEM
        grid=(n_chunks,),
        in_specs=[
            pl.BlockSpec((t_chunk * Bp, Ep), x_index_map),       # x chunk (pipelined DMA)
            inv((Bp, Hp)),                                       # lens
            inv((Ep, 4 * Hp)),                                   # w_ih
            inv((Hp, 4 * Hp)),                                   # w_hh
            inv((t_chunk * Bp, 4 * Hp)),                         # fused bias (broadcast)
            inv((Hp, Pp)),                                       # w_dense
            inv((Bp, Pp)),                                       # b_dense
        ],
        out_specs=pl.BlockSpec((Bp, Pp), lambda c, ml: (0, 0)),
        scratch_shapes=[
            pltpu.VMEM((Bp, Hp), jnp.bfloat16),                  # h state (MXU operand)
            pltpu.VMEM((Bp, Hp), jnp.float32),                   # c state
            pltpu.VMEM((t_chunk * Bp, 4 * Hp), jnp.float32),     # chunk pre-gates
        ],
    )

    # VMEM budget derived from the actual buffers (2x headroom), clamped to a range
    # that is safe on every generation (v7x physical VMEM is only 64 MiB).
    # TODO(synk): when E/H scale, raise the cap toward ~100 MiB on v5e/v6e only.
    bytes_needed = (
        2 * (t_chunk * Bp * Ep * 2)            # x chunk, bf16, double-buffered
        + (t_chunk * Bp * 4 * Hp) * 4          # pre-gate scratch, f32
        + (t_chunk * Bp * 4 * Hp) * 4          # broadcast bias, f32, single-buffered
        + (Ep + Hp) * 4 * Hp * 2               # w_ih + w_hh, bf16, single-buffered
        + Hp * Pp * 2 + Bp * Pp * 4            # dense weight (bf16) + bias (f32)
        + Bp * Hp * (4 + 2 + 4)                # lens (i32) + h (bf16) + c (f32)
        + 2 * Bp * Pp * 4                      # output block (double-buffered)
    )
    vmem_limit = int(min(max(2 * bytes_needed, 16 * 1024 * 1024), 48 * 1024 * 1024))

    out = pl.pallas_call(
        lstm_kernel,
        out_shape=jax.ShapeDtypeStruct((Bp, Pp), jnp.float32),
        grid_spec=grid_spec,
        compiler_params=pltpu.CompilerParams(
            dimension_semantics=("arbitrary",),                  # serial over time chunks
            vmem_limit_bytes=vmem_limit),
    )(max_len, x_flat, lens, w_ih, w_hh, bias, w_d, b_d)

    return out[:B, :P]


def lstm_reference(text, embedding_matrix, params):
    """Pure-JAX f32 reference with the original PyTorch (i,f,g,o) gate order."""
    x = embedding_matrix[text].astype(jnp.float32)
    x_len = jnp.sum(text != 0, axis=-1)
    B, S, _ = x.shape
    H = params["w_hh"].shape[0]
    h = jnp.zeros((B, H), jnp.float32)
    c = jnp.zeros((B, H), jnp.float32)
    bias = params["b_ih"] + params["b_hh"]
    for t in range(S):
        g = x[:, t] @ params["w_ih"] + h @ params["w_hh"] + bias
        i_g = jax.nn.sigmoid(g[:, 0 * H:1 * H])
        f_g = jax.nn.sigmoid(g[:, 1 * H:2 * H])
        g_g = jnp.tanh(g[:, 2 * H:3 * H])
        o_g = jax.nn.sigmoid(g[:, 3 * H:4 * H])
        c_new = f_g * c + i_g * g_g
        h_new = o_g * jnp.tanh(c_new)
        m = (t < x_len)[:, None]
        h = jnp.where(m, h_new, h)
        c = jnp.where(m, c_new, c)
    return h @ params["w_dense"] + params["b_dense"]


if __name__ == "__main__":
    # Small shapes consistent with the module: vocab=20, embed=32, hidden=32,
    # polarities=3, batch=2, seq=8.
    V, E, H, P = 20, 32, 32, 3
    B, S = 2, 8

    key = jax.random.PRNGKey(0)
    k1, k2, k3, k4, k5, k6, k7 = jax.random.split(key, 7)

    embedding_matrix = 0.1 * jax.random.normal(k1, (V, E), jnp.float32)
    embedding_matrix = embedding_matrix.at[0].set(0.0)           # pad row

    scale = 1.0 / jnp.sqrt(jnp.float32(H))
    params = {
        "w_ih": jax.random.uniform(k2, (E, 4 * H), jnp.float32, -scale, scale),
        "w_hh": jax.random.uniform(k3, (H, 4 * H), jnp.float32, -scale, scale),
        "b_ih": jax.random.uniform(k4, (4 * H,), jnp.float32, -scale, scale),
        "b_hh": jax.random.uniform(k5, (4 * H,), jnp.float32, -scale, scale),
        "w_dense": jax.random.uniform(k6, (H, P), jnp.float32, -scale, scale),
        "b_dense": jax.random.uniform(k7, (P,), jnp.float32, -scale, scale),
    }

    # Token ids with trailing zero padding (variable lengths: 5 and 7).
    text = jnp.array([[3, 7, 1, 5, 2, 0, 0, 0],
                      [9, 4, 6, 2, 8, 3, 1, 0]], dtype=jnp.int32)

    out = lstm_forward(text, embedding_matrix, params)     # t_chunk = S -> one grid step
    jax.block_until_ready(out)
    assert out.shape == (B, P)

    ref = lstm_reference(text, embedding_matrix, params)
    assert jnp.allclose(out, ref, atol=5e-2, rtol=5e-2), (
        f"max abs diff {jnp.max(jnp.abs(out - ref))}")
    print("KERNEL_OK")
</pallas_src>

<mosaic_0001>
module attributes {stable_mosaic.version = 11 : i64} {
  func.func @lstm_kernel(%arg0: i32, %arg1: memref<1xi32, #tpu.memory_space<smem>>, %arg2: memref<64x128xbf16, #tpu.memory_space<vmem>>, %arg3: memref<8x128xi32, #tpu.memory_space<vmem>>, %arg4: memref<128x512xbf16, #tpu.memory_space<vmem>>, %arg5: memref<128x512xbf16, #tpu.memory_space<vmem>>, %arg6: memref<64x512xf32, #tpu.memory_space<vmem>>, %arg7: memref<128x128xbf16, #tpu.memory_space<vmem>>, %arg8: memref<8x128xf32, #tpu.memory_space<vmem>>, %arg9: memref<8x128xf32, #tpu.memory_space<vmem>>, %arg10: memref<8x128xbf16, #tpu.memory_space<vmem>>, %arg11: memref<8x128xf32, #tpu.memory_space<vmem>>, %arg12: memref<64x512xf32, #tpu.memory_space<vmem>>) attributes {dimension_semantics = [#tpu.dimension_semantics<arbitrary>], iteration_bounds = array<i64: 1>, scalar_prefetch = 1 : i64, scratch_operands = 3 : i64, tpu.core_type = #tpu.core_type<tc>, window_params = [{transform_indices = @transform_0, window_bounds = array<i64: 64, 128>}, {pipeline_mode = #tpu.pipeline_mode<synchronous>, transform_indices = @transform_1, window_bounds = array<i64: 8, 128>}, {pipeline_mode = #tpu.pipeline_mode<synchronous>, transform_indices = @transform_2, window_bounds = array<i64: 128, 512>}, {pipeline_mode = #tpu.pipeline_mode<synchronous>, transform_indices = @transform_3, window_bounds = array<i64: 128, 512>}, {pipeline_mode = #tpu.pipeline_mode<synchronous>, transform_indices = @transform_4, window_bounds = array<i64: 64, 512>}, {pipeline_mode = #tpu.pipeline_mode<synchronous>, transform_indices = @transform_5, window_bounds = array<i64: 128, 128>}, {pipeline_mode = #tpu.pipeline_mode<synchronous>, transform_indices = @transform_6, window_bounds = array<i64: 8, 128>}, {pipeline_mode = #tpu.pipeline_mode<synchronous>, transform_indices = @transform_7, window_bounds = array<i64: 8, 128>}]} {
    %c8_i32 = arith.constant 8 : i32
    %0 = arith.muli %arg0, %c8_i32 : i32
    %c0_i32 = arith.constant 0 : i32
    %1 = arith.cmpi eq, %arg0, %c0_i32 : i32
    %2 = arith.extui %1 : i1 to i32
    %c0_i32_0 = arith.constant 0 : i32
    %3 = arith.cmpi ne, %2, %c0_i32_0 : i32
    scf.if %3 {
      %cst = arith.constant 0.000000e+00 : bf16
      %11 = vector.broadcast %cst : bf16 to vector<8x128xbf16>
      %c0_4 = arith.constant 0 : index
      %c0_5 = arith.constant 0 : index
      %12 = vector.load %arg10[%c0_4, %c0_5] : memref<8x128xbf16, #tpu.memory_space<vmem>>, vector<8x128xbf16>
      tpu.vector_store %arg10[%c0_4, %c0_5], %11 {strides = array<i32>} : memref<8x128xbf16, #tpu.memory_space<vmem>>, vector<8x128xbf16>,
      %cst_6 = arith.constant 0.000000e+00 : f32
      %13 = vector.broadcast %cst_6 : f32 to vector<8x128xf32>
      %c0_7 = arith.constant 0 : index
      %c0_8 = arith.constant 0 : index
      %14 = vector.load %arg11[%c0_7, %c0_8] : memref<8x128xf32, #tpu.memory_space<vmem>>, vector<8x128xf32>
      tpu.vector_store %arg11[%c0_7, %c0_8], %13 {strides = array<i32>} : memref<8x128xf32, #tpu.memory_space<vmem>>, vector<8x128xf32>,
    } else {
    }
    %c0 = arith.constant 0 : index
    %4 = memref.load %arg1[%c0] : memref<1xi32, #tpu.memory_space<smem>>
    %5 = arith.cmpi slt, %0, %4 : i32
    %6 = arith.extui %5 : i1 to i32
    %c0_i32_1 = arith.constant 0 : i32
    %7 = arith.cmpi ne, %6, %c0_i32_1 : i32
    scf.if %7 {
      %c0_4 = arith.constant 0 : index
      %c0_5 = arith.constant 0 : index
      %11 = vector.load %arg2[%c0_4, %c0_5] : memref<64x128xbf16, #tpu.memory_space<vmem>>, vector<64x128xbf16>
      %c0_6 = arith.constant 0 : index
      %c0_7 = arith.constant 0 : index
      %12 = vector.load %arg4[%c0_6, %c0_7] : memref<128x512xbf16, #tpu.memory_space<vmem>>, vector<128x512xbf16>
      %cst = arith.constant dense<0.000000e+00> : vector<64x512xf32>
      %13 = tpu.matmul %11, %12, %cst {dimension_numbers = #tpu.dot_dimension_numbers<[1], [0], [0], [1], [0, 0, 1, 1], [], []>} : vector<64x128xbf16>, vector<128x512xbf16>, vector<64x512xf32> -> vector<64x512xf32>
      %c0_8 = arith.constant 0 : index
      %c0_9 = arith.constant 0 : index
      %14 = vector.load %arg6[%c0_8, %c0_9] : memref<64x512xf32, #tpu.memory_space<vmem>>, vector<64x512xf32>
      %15 = arith.addf %13, %14 : vector<64x512xf32>
      %c0_10 = arith.constant 0 : index
      %c0_11 = arith.constant 0 : index
      %16 = vector.load %arg12[%c0_10, %c0_11] : memref<64x512xf32, #tpu.memory_space<vmem>>, vector<64x512xf32>
      tpu.vector_store %arg12[%c0_10, %c0_11], %15 {strides = array<i32>} : memref<64x512xf32, #tpu.memory_space<vmem>>, vector<64x512xf32>,
      %c0_12 = arith.constant 0 : index
      %c0_13 = arith.constant 0 : index
      %17 = vector.load %arg3[%c0_12, %c0_13] : memref<8x128xi32, #tpu.memory_space<vmem>>, vector<8x128xi32>
      %c0_14 = arith.constant 0 : index
      %c0_15 = arith.constant 0 : index
      %18 = vector.load %arg10[%c0_14, %c0_15] : memref<8x128xbf16, #tpu.memory_space<vmem>>, vector<8x128xbf16>
      %c0_16 = arith.constant 0 : index
      %c0_17 = arith.constant 0 : index
      %19 = vector.load %arg11[%c0_16, %c0_17] : memref<8x128xf32, #tpu.memory_space<vmem>>, vector<8x128xf32>
      %c0_18 = arith.constant 0 : index
      %c0_19 = arith.constant 0 : index
      %20 = vector.load %arg12[%c0_18, %c0_19] : memref<64x512xf32, #tpu.memory_space<vmem>>, vector<8x512xf32>
      %c0_i32_20 = arith.constant 0 : i32
      %21 = arith.addi %0, %c0_i32_20 : i32
      %c0_21 = arith.constant 0 : index
      %c0_22 = arith.constant 0 : index
      %22 = vector.load %arg5[%c0_21, %c0_22] : memref<128x512xbf16, #tpu.memory_space<vmem>>, vector<128x512xbf16>
      %cst_23 = arith.constant dense<0.000000e+00> : vector<8x512xf32>
      %23 = tpu.matmul %18, %22, %cst_23 {dimension_numbers = #tpu.dot_dimension_numbers<[1], [0], [0], [1], [0, 0, 1, 1], [], []>} : vector<8x128xbf16>, vector<128x512xbf16>, vector<8x512xf32> -> vector<8x512xf32>
      %24 = arith.addf %20, %23 : vector<8x512xf32>
      %25 = vector.extract_strided_slice %24 {offsets = [0, 0], sizes = [8, 384], strides = [1, 1]} : vector<8x512xf32> to vector<8x384xf32>
      %cst_24 = arith.constant 5.000000e-01 : f32
      %26 = vector.broadcast %cst_24 : f32 to vector<8x384xf32>
      %27 = arith.mulf %26, %25 : vector<8x384xf32>
      %28 = math.tanh %27 : vector<8x384xf32>
      %cst_25 = arith.constant 5.000000e-01 : f32
      %29 = vector.broadcast %cst_25 : f32 to vector<8x384xf32>
      %30 = arith.mulf %29, %28 : vector<8x384xf32>
      %cst_26 = arith.constant 5.000000e-01 : f32
      %31 = vector.broadcast %cst_26 : f32 to vector<8x384xf32>
      %32 = arith.addf %30, %31 : vector<8x384xf32>
      %33 = vector.extract_strided_slice %32 {offsets = [0, 0], sizes = [8, 128], strides = [1, 1]} : vector<8x384xf32> to vector<8x128xf32>
      %34 = vector.extract_strided_slice %32 {offsets = [0, 128], sizes = [8, 128], strides = [1, 1]} : vector<8x384xf32> to vector<8x128xf32>
      %35 = vector.extract_strided_slice %32 {offsets = [0, 256], sizes = [8, 128], strides = [1, 1]} : vector<8x384xf32> to vector<8x128xf32>
      %36 = vector.extract_strided_slice %24 {offsets = [0, 384], sizes = [8, 128], strides = [1, 1]} : vector<8x512xf32> to vector<8x128xf32>
      %37 = math.tanh %36 : vector<8x128xf32>
      %38 = arith.mulf %34, %19 : vector<8x128xf32>
      %39 = arith.mulf %33, %37 : vector<8x128xf32>
      %40 = arith.addf %38, %39 : vector<8x128xf32>
      %41 = math.tanh %40 : vector<8x128xf32>
      %42 = arith.mulf %35, %41 : vector<8x128xf32>
      %43 = vector.broadcast %21 : i32 to vector<8x128xi32>
      %44 = arith.cmpi sgt, %17, %43 : vector<8x128xi32>
      %45 = arith.select %44, %40, %19 : vector<8x128xi1>, vector<8x128xf32>
      %46 = arith.truncf %42 : vector<8x128xf32> to vector<8x128xbf16>
      %47 = arith.select %44, %46, %18 : vector<8x128xi1>, vector<8x128xbf16>
      %c8 = arith.constant 8 : index
      %c0_27 = arith.constant 0 : index
      %48 = vector.load %arg12[%c8, %c0_27] : memref<64x512xf32, #tpu.memory_space<vmem>>, vector<8x512xf32>
      %c1_i32 = arith.constant 1 : i32
      %49 = arith.addi %0, %c1_i32 : i32
      %c0_28 = arith.constant 0 : index
      %c0_29 = arith.constant 0 : index
      %50 = vector.load %arg5[%c0_28, %c0_29] : memref<128x512xbf16, #tpu.memory_space<vmem>>, vector<128x512xbf16>
      %cst_30 = arith.constant dense<0.000000e+00> : vector<8x512xf32>
      %51 = tpu.matmul %47, %50, %cst_30 {dimension_numbers = #tpu.dot_dimension_numbers<[1], [0], [0], [1], [0, 0, 1, 1], [], []>} : vector<8x128xbf16>, vector<128x512xbf16>, vector<8x512xf32> -> vector<8x512xf32>
      %52 = arith.addf %48, %51 : vector<8x512xf32>
      %53 = vector.extract_strided_slice %52 {offsets = [0, 0], sizes = [8, 384], strides = [1, 1]} : vector<8x512xf32> to vector<8x384xf32>
      %cst_31 = arith.constant 5.000000e-01 : f32
      %54 = vector.broadcast %cst_31 : f32 to vector<8x384xf32>
      %55 = arith.mulf %54, %53 : vector<8x384xf32>
      %56 = math.tanh %55 : vector<8x384xf32>
      %cst_32 = arith.constant 5.000000e-01 : f32
      %57 = vector.broadcast %cst_32 : f32 to vector<8x384xf32>
      %58 = arith.mulf %57, %56 : vector<8x384xf32>
      %cst_33 = arith.constant 5.000000e-01 : f32
      %59 = vector.broadcast %cst_33 : f32 to vector<8x384xf32>
      %60 = arith.addf %58, %59 : vector<8x384xf32>
      %61 = vector.extract_strided_slice %60 {offsets = [0, 0], sizes = [8, 128], strides = [1, 1]} : vector<8x384xf32> to vector<8x128xf32>
      %62 = vector.extract_strided_slice %60 {offsets = [0, 128], sizes = [8, 128], strides = [1, 1]} : vector<8x384xf32> to vector<8x128xf32>
      %63 = vector.extract_strided_slice %60 {offsets = [0, 256], sizes = [8, 128], strides = [1, 1]} : vector<8x384xf32> to vector<8x128xf32>
      %64 = vector.extract_strided_slice %52 {offsets = [0, 384], sizes = [8, 128], strides = [1, 1]} : vector<8x512xf32> to vector<8x128xf32>
      %65 = math.tanh %64 : vector<8x128xf32>
      %66 = arith.mulf %62, %45 : vector<8x128xf32>
      %67 = arith.mulf %61, %65 : vector<8x128xf32>
      %68 = arith.addf %66, %67 : vector<8x128xf32>
      %69 = math.tanh %68 : vector<8x128xf32>
      %70 = arith.mulf %63, %69 : vector<8x128xf32>
      %71 = vector.broadcast %49 : i32 to vector<8x128xi32>
      %72 = arith.cmpi sgt, %17, %71 : vector<8x128xi32>
      %73 = arith.select %72, %68, %45 : vector<8x128xi1>, vector<8x128xf32>
      %74 = arith.truncf %70 : vector<8x128xf32> to vector<8x128xbf16>
      %75 = arith.select %72, %74, %47 : vector<8x128xi1>, vector<8x128xbf16>
      %c16 = arith.constant 16 : index
      %c0_34 = arith.constant 0 : index
      %76 = vector.load %arg12[%c16, %c0_34] : memref<64x512xf32, #tpu.memory_space<vmem>>, vector<8x512xf32>
      %c2_i32 = arith.constant 2 : i32
      %77 = arith.addi %0, %c2_i32 : i32
      %c0_35 = arith.constant 0 : index
      %c0_36 = arith.constant 0 : index
      %78 = vector.load %arg5[%c0_35, %c0_36] : memref<128x512xbf16, #tpu.memory_space<vmem>>, vector<128x512xbf16>
      %cst_37 = arith.constant dense<0.000000e+00> : vector<8x512xf32>
      %79 = tpu.matmul %75, %78, %cst_37 {dimension_numbers = #tpu.dot_dimension_numbers<[1], [0], [0], [1], [0, 0, 1, 1], [], []>} : vector<8x128xbf16>, vector<128x512xbf16>, vector<8x512xf32> -> vector<8x512xf32>
      %80 = arith.addf %76, %79 : vector<8x512xf32>
      %81 = vector.extract_strided_slice %80 {offsets = [0, 0], sizes = [8, 384], strides = [1, 1]} : vector<8x512xf32> to vector<8x384xf32>
      %cst_38 = arith.constant 5.000000e-01 : f32
      %82 = vector.broadcast %cst_38 : f32 to vector<8x384xf32>
      %83 = arith.mulf %82, %81 : vector<8x384xf32>
      %84 = math.tanh %83 : vector<8x384xf32>
      %cst_39 = arith.constant 5.000000e-01 : f32
      %85 = vector.broadcast %cst_39 : f32 to vector<8x384xf32>
      %86 = arith.mulf %85, %84 : vector<8x384xf32>
      %cst_40 = arith.constant 5.000000e-01 : f32
      %87 = vector.broadcast %cst_40 : f32 to vector<8x384xf32>
      %88 = arith.addf %86, %87 : vector<8x384xf32>
      %89 = vector.extract_strided_slice %88 {offsets = [0, 0], sizes = [8, 128], strides = [1, 1]} : vector<8x384xf32> to vector<8x128xf32>
      %90 = vector.extract_strided_slice %88 {offsets = [0, 128], sizes = [8, 128], strides = [1, 1]} : vector<8x384xf32> to vector<8x128xf32>
      %91 = vector.extract_strided_slice %88 {offsets = [0, 256], sizes = [8, 128], strides = [1, 1]} : vector<8x384xf32> to vector<8x128xf32>
      %92 = vector.extract_strided_slice %80 {offsets = [0, 384], sizes = [8, 128], strides = [1, 1]} : vector<8x512xf32> to vector<8x128xf32>
      %93 = math.tanh %92 : vector<8x128xf32>
      %94 = arith.mulf %90, %73 : vector<8x128xf32>
      %95 = arith.mulf %89, %93 : vector<8x128xf32>
      %96 = arith.addf %94, %95 : vector<8x128xf32>
      %97 = math.tanh %96 : vector<8x128xf32>
      %98 = arith.mulf %91, %97 : vector<8x128xf32>
      %99 = vector.broadcast %77 : i32 to vector<8x128xi32>
      %100 = arith.cmpi sgt, %17, %99 : vector<8x128xi32>
      %101 = arith.select %100, %96, %73 : vector<8x128xi1>, vector<8x128xf32>
      %102 = arith.truncf %98 : vector<8x128xf32> to vector<8x128xbf16>
      %103 = arith.select %100, %102, %75 : vector<8x128xi1>, vector<8x128xbf16>
      %c24 = arith.constant 24 : index
      %c0_41 = arith.constant 0 : index
      %104 = vector.load %arg12[%c24, %c0_41] : memref<64x512xf32, #tpu.memory_space<vmem>>, vector<8x512xf32>
      %c3_i32 = arith.constant 3 : i32
      %105 = arith.addi %0, %c3_i32 : i32
      %c0_42 = arith.constant 0 : index
      %c0_43 = arith.constant 0 : index
      %106 = vector.load %arg5[%c0_42, %c0_43] : memref<128x512xbf16, #tpu.memory_space<vmem>>, vector<128x512xbf16>
      %cst_44 = arith.constant dense<0.000000e+00> : vector<8x512xf32>
      %107 = tpu.matmul %103, %106, %cst_44 {dimension_numbers = #tpu.dot_dimension_numbers<[1], [0], [0], [1], [0, 0, 1, 1], [], []>} : vector<8x128xbf16>, vector<128x512xbf16>, vector<8x512xf32> -> vector<8x512xf32>
      %108 = arith.addf %104, %107 : vector<8x512xf32>
      %109 = vector.extract_strided_slice %108 {offsets = [0, 0], sizes = [8, 384], strides = [1, 1]} : vector<8x512xf32> to vector<8x384xf32>
      %cst_45 = arith.constant 5.000000e-01 : f32
      %110 = vector.broadcast %cst_45 : f32 to vector<8x384xf32>
      %111 = arith.mulf %110, %109 : vector<8x384xf32>
      %112 = math.tanh %111 : vector<8x384xf32>
      %cst_46 = arith.constant 5.000000e-01 : f32
      %113 = vector.broadcast %cst_46 : f32 to vector<8x384xf32>
      %114 = arith.mulf %113, %112 : vector<8x384xf32>
      %cst_47 = arith.constant 5.000000e-01 : f32
      %115 = vector.broadcast %cst_47 : f32 to vector<8x384xf32>
      %116 = arith.addf %114, %115 : vector<8x384xf32>
      %117 = vector.extract_strided_slice %116 {offsets = [0, 0], sizes = [8, 128], strides = [1, 1]} : vector<8x384xf32> to vector<8x128xf32>
      %118 = vector.extract_strided_slice %116 {offsets = [0, 128], sizes = [8, 128], strides = [1, 1]} : vector<8x384xf32> to vector<8x128xf32>
      %119 = vector.extract_strided_slice %116 {offsets = [0, 256], sizes = [8, 128], strides = [1, 1]} : vector<8x384xf32> to vector<8x128xf32>
      %120 = vector.extract_strided_slice %108 {offsets = [0, 384], sizes = [8, 128], strides = [1, 1]} : vector<8x512xf32> to vector<8x128xf32>
      %121 = math.tanh %120 : vector<8x128xf32>
      %122 = arith.mulf %118, %101 : vector<8x128xf32>
      %123 = arith.mulf %117, %121 : vector<8x128xf32>
      %124 = arith.addf %122, %123 : vector<8x128xf32>
      %125 = math.tanh %124 : vector<8x128xf32>
      %126 = arith.mulf %119, %125 : vector<8x128xf32>
      %127 = vector.broadcast %105 : i32 to vector<8x128xi32>
      %128 = arith.cmpi sgt, %17, %127 : vector<8x128xi32>
      %129 = arith.select %128, %124, %101 : vector<8x128xi1>, vector<8x128xf32>
      %130 = arith.truncf %126 : vector<8x128xf32> to vector<8x128xbf16>
      %131 = arith.select %128, %130, %103 : vector<8x128xi1>, vector<8x128xbf16>
      %c32 = arith.constant 32 : index
      %c0_48 = arith.constant 0 : index
      %132 = vector.load %arg12[%c32, %c0_48] : memref<64x512xf32, #tpu.memory_space<vmem>>, vector<8x512xf32>
      %c4_i32 = arith.constant 4 : i32
      %133 = arith.addi %0, %c4_i32 : i32
      %c0_49 = arith.constant 0 : index
      %c0_50 = arith.constant 0 : index
      %134 = vector.load %arg5[%c0_49, %c0_50] : memref<128x512xbf16, #tpu.memory_space<vmem>>, vector<128x512xbf16>
      %cst_51 = arith.constant dense<0.000000e+00> : vector<8x512xf32>
      %135 = tpu.matmul %131, %134, %cst_51 {dimension_numbers = #tpu.dot_dimension_numbers<[1], [0], [0], [1], [0, 0, 1, 1], [], []>} : vector<8x128xbf16>, vector<128x512xbf16>, vector<8x512xf32> -> vector<8x512xf32>
      %136 = arith.addf %132, %135 : vector<8x512xf32>
      %137 = vector.extract_strided_slice %136 {offsets = [0, 0], sizes = [8, 384], strides = [1, 1]} : vector<8x512xf32> to vector<8x384xf32>
      %cst_52 = arith.constant 5.000000e-01 : f32
      %138 = vector.broadcast %cst_52 : f32 to vector<8x384xf32>
      %139 = arith.mulf %138, %137 : vector<8x384xf32>
      %140 = math.tanh %139 : vector<8x384xf32>
      %cst_53 = arith.constant 5.000000e-01 : f32
      %141 = vector.broadcast %cst_53 : f32 to vector<8x384xf32>
      %142 = arith.mulf %141, %140 : vector<8x384xf32>
      %cst_54 = arith.constant 5.000000e-01 : f32
      %143 = vector.broadcast %cst_54 : f32 to vector<8x384xf32>
      %144 = arith.addf %142, %143 : vector<8x384xf32>
      %145 = vector.extract_strided_slice %144 {offsets = [0, 0], sizes = [8, 128], strides = [1, 1]} : vector<8x384xf32> to vector<8x128xf32>
      %146 = vector.extract_strided_slice %144 {offsets = [0, 128], sizes = [8, 128], strides = [1, 1]} : vector<8x384xf32> to vector<8x128xf32>
      %147 = vector.extract_strided_slice %144 {offsets = [0, 256], sizes = [8, 128], strides = [1, 1]} : vector<8x384xf32> to vector<8x128xf32>
      %148 = vector.extract_strided_slice %136 {offsets = [0, 384], sizes = [8, 128], strides = [1, 1]} : vector<8x512xf32> to vector<8x128xf32>
      %149 = math.tanh %148 : vector<8x128xf32>
      %150 = arith.mulf %146, %129 : vector<8x128xf32>
      %151 = arith.mulf %145, %149 : vector<8x128xf32>
      %152 = arith.addf %150, %151 : vector<8x128xf32>
      %153 = math.tanh %152 : vector<8x128xf32>
      %154 = arith.mulf %147, %153 : vector<8x128xf32>
      %155 = vector.broadcast %133 : i32 to vector<8x128xi32>
      %156 = arith.cmpi sgt, %17, %155 : vector<8x128xi32>
      %157 = arith.select %156, %152, %129 : vector<8x128xi1>, vector<8x128xf32>
      %158 = arith.truncf %154 : vector<8x128xf32> to vector<8x128xbf16>
      %159 = arith.select %156, %158, %131 : vector<8x128xi1>, vector<8x128xbf16>
      %c40 = arith.constant 40 : index
      %c0_55 = arith.constant 0 : index
      %160 = vector.load %arg12[%c40, %c0_55] : memref<64x512xf32, #tpu.memory_space<vmem>>, vector<8x512xf32>
      %c5_i32 = arith.constant 5 : i32
      %161 = arith.addi %0, %c5_i32 : i32
      %c0_56 = arith.constant 0 : index
      %c0_57 = arith.constant 0 : index
      %162 = vector.load %arg5[%c0_56, %c0_57] : memref<128x512xbf16, #tpu.memory_space<vmem>>, vector<128x512xbf16>
      %cst_58 = arith.constant dense<0.000000e+00> : vector<8x512xf32>
      %163 = tpu.matmul %159, %162, %cst_58 {dimension_numbers = #tpu.dot_dimension_numbers<[1], [0], [0], [1], [0, 0, 1, 1], [], []>} : vector<8x128xbf16>, vector<128x512xbf16>, vector<8x512xf32> -> vector<8x512xf32>
      %164 = arith.addf %160, %163 : vector<8x512xf32>
      %165 = vector.extract_strided_slice %164 {offsets = [0, 0], sizes = [8, 384], strides = [1, 1]} : vector<8x512xf32> to vector<8x384xf32>
      %cst_59 = arith.constant 5.000000e-01 : f32
      %166 = vector.broadcast %cst_59 : f32 to vector<8x384xf32>
      %167 = arith.mulf %166, %165 : vector<8x384xf32>
      %168 = math.tanh %167 : vector<8x384xf32>
      %cst_60 = arith.constant 5.000000e-01 : f32
      %169 = vector.broadcast %cst_60 : f32 to vector<8x384xf32>
      %170 = arith.mulf %169, %168 : vector<8x384xf32>
      %cst_61 = arith.constant 5.000000e-01 : f32
      %171 = vector.broadcast %cst_61 : f32 to vector<8x384xf32>
      %172 = arith.addf %170, %171 : vector<8x384xf32>
      %173 = vector.extract_strided_slice %172 {offsets = [0, 0], sizes = [8, 128], strides = [1, 1]} : vector<8x384xf32> to vector<8x128xf32>
      %174 = vector.extract_strided_slice %172 {offsets = [0, 128], sizes = [8, 128], strides = [1, 1]} : vector<8x384xf32> to vector<8x128xf32>
      %175 = vector.extract_strided_slice %172 {offsets = [0, 256], sizes = [8, 128], strides = [1, 1]} : vector<8x384xf32> to vector<8x128xf32>
      %176 = vector.extract_strided_slice %164 {offsets = [0, 384], sizes = [8, 128], strides = [1, 1]} : vector<8x512xf32> to vector<8x128xf32>
      %177 = math.tanh %176 : vector<8x128xf32>
      %178 = arith.mulf %174, %157 : vector<8x128xf32>
      %179 = arith.mulf %173, %177 : vector<8x128xf32>
      %180 = arith.addf %178, %179 : vector<8x128xf32>
      %181 = math.tanh %180 : vector<8x128xf32>
      %182 = arith.mulf %175, %181 : vector<8x128xf32>
      %183 = vector.broadcast %161 : i32 to vector<8x128xi32>
      %184 = arith.cmpi sgt, %17, %183 : vector<8x128xi32>
      %185 = arith.select %184, %180, %157 : vector<8x128xi1>, vector<8x128xf32>
      %186 = arith.truncf %182 : vector<8x128xf32> to vector<8x128xbf16>
      %187 = arith.select %184, %186, %159 : vector<8x128xi1>, vector<8x128xbf16>
      %c48 = arith.constant 48 : index
      %c0_62 = arith.constant 0 : index
      %188 = vector.load %arg12[%c48, %c0_62] : memref<64x512xf32, #tpu.memory_space<vmem>>, vector<8x512xf32>
      %c6_i32 = arith.constant 6 : i32
      %189 = arith.addi %0, %c6_i32 : i32
      %c0_63 = arith.constant 0 : index
      %c0_64 = arith.constant 0 : index
      %190 = vector.load %arg5[%c0_63, %c0_64] : memref<128x512xbf16, #tpu.memory_space<vmem>>, vector<128x512xbf16>
      %cst_65 = arith.constant dense<0.000000e+00> : vector<8x512xf32>
      %191 = tpu.matmul %187, %190, %cst_65 {dimension_numbers = #tpu.dot_dimension_numbers<[1], [0], [0], [1], [0, 0, 1, 1], [], []>} : vector<8x128xbf16>, vector<128x512xbf16>, vector<8x512xf32> -> vector<8x512xf32>
      %192 = arith.addf %188, %191 : vector<8x512xf32>
      %193 = vector.extract_strided_slice %192 {offsets = [0, 0], sizes = [8, 384], strides = [1, 1]} : vector<8x512xf32> to vector<8x384xf32>
      %cst_66 = arith.constant 5.000000e-01 : f32
      %194 = vector.broadcast %cst_66 : f32 to vector<8x384xf32>
      %195 = arith.mulf %194, %193 : vector<8x384xf32>
      %196 = math.tanh %195 : vector<8x384xf32>
      %cst_67 = arith.constant 5.000000e-01 : f32
      %197 = vector.broadcast %cst_67 : f32 to vector<8x384xf32>
      %198 = arith.mulf %197, %196 : vector<8x384xf32>
      %cst_68 = arith.constant 5.000000e-01 : f32
      %199 = vector.broadcast %cst_68 : f32 to vector<8x384xf32>
      %200 = arith.addf %198, %199 : vector<8x384xf32>
      %201 = vector.extract_strided_slice %200 {offsets = [0, 0], sizes = [8, 128], strides = [1, 1]} : vector<8x384xf32> to vector<8x128xf32>
      %202 = vector.extract_strided_slice %200 {offsets = [0, 128], sizes = [8, 128], strides = [1, 1]} : vector<8x384xf32> to vector<8x128xf32>
      %203 = vector.extract_strided_slice %200 {offsets = [0, 256], sizes = [8, 128], strides = [1, 1]} : vector<8x384xf32> to vector<8x128xf32>
      %204 = vector.extract_strided_slice %192 {offsets = [0, 384], sizes = [8, 128], strides = [1, 1]} : vector<8x512xf32> to vector<8x128xf32>
      %205 = math.tanh %204 : vector<8x128xf32>
      %206 = arith.mulf %202, %185 : vector<8x128xf32>
      %207 = arith.mulf %201, %205 : vector<8x128xf32>
      %208 = arith.addf %206, %207 : vector<8x128xf32>
      %209 = math.tanh %208 : vector<8x128xf32>
      %210 = arith.mulf %203, %209 : vector<8x128xf32>
      %211 = vector.broadcast %189 : i32 to vector<8x128xi32>
      %212 = arith.cmpi sgt, %17, %211 : vector<8x128xi32>
      %213 = arith.select %212, %208, %185 : vector<8x128xi1>, vector<8x128xf32>
      %214 = arith.truncf %210 : vector<8x128xf32> to vector<8x128xbf16>
      %215 = arith.select %212, %214, %187 : vector<8x128xi1>, vector<8x128xbf16>
      %c56 = arith.constant 56 : index
      %c0_69 = arith.constant 0 : index
      %216 = vector.load %arg12[%c56, %c0_69] : memref<64x512xf32, #tpu.memory_space<vmem>>, vector<8x512xf32>
      %c7_i32 = arith.constant 7 : i32
      %217 = arith.addi %0, %c7_i32 : i32
      %c0_70 = arith.constant 0 : index
      %c0_71 = arith.constant 0 : index
      %218 = vector.load %arg5[%c0_70, %c0_71] : memref<128x512xbf16, #tpu.memory_space<vmem>>, vector<128x512xbf16>
      %cst_72 = arith.constant dense<0.000000e+00> : vector<8x512xf32>
      %219 = tpu.matmul %215, %218, %cst_72 {dimension_numbers = #tpu.dot_dimension_numbers<[1], [0], [0], [1], [0, 0, 1, 1], [], []>} : vector<8x128xbf16>, vector<128x512xbf16>, vector<8x512xf32> -> vector<8x512xf32>
      %220 = arith.addf %216, %219 : vector<8x512xf32>
      %221 = vector.extract_strided_slice %220 {offsets = [0, 0], sizes = [8, 384], strides = [1, 1]} : vector<8x512xf32> to vector<8x384xf32>
      %cst_73 = arith.constant 5.000000e-01 : f32
      %222 = vector.broadcast %cst_73 : f32 to vector<8x384xf32>
      %223 = arith.mulf %222, %221 : vector<8x384xf32>
      %224 = math.tanh %223 : vector<8x384xf32>
      %cst_74 = arith.constant 5.000000e-01 : f32
      %225 = vector.broadcast %cst_74 : f32 to vector<8x384xf32>
      %226 = arith.mulf %225, %224 : vector<8x384xf32>
      %cst_75 = arith.constant 5.000000e-01 : f32
      %227 = vector.broadcast %cst_75 : f32 to vector<8x384xf32>
      %228 = arith.addf %226, %227 : vector<8x384xf32>
      %229 = vector.extract_strided_slice %228 {offsets = [0, 0], sizes = [8, 128], strides = [1, 1]} : vector<8x384xf32> to vector<8x128xf32>
      %230 = vector.extract_strided_slice %228 {offsets = [0, 128], sizes = [8, 128], strides = [1, 1]} : vector<8x384xf32> to vector<8x128xf32>
      %231 = vector.extract_strided_slice %228 {offsets = [0, 256], sizes = [8, 128], strides = [1, 1]} : vector<8x384xf32> to vector<8x128xf32>
      %232 = vector.extract_strided_slice %220 {offsets = [0, 384], sizes = [8, 128], strides = [1, 1]} : vector<8x512xf32> to vector<8x128xf32>
      %233 = math.tanh %232 : vector<8x128xf32>
      %234 = arith.mulf %230, %213 : vector<8x128xf32>
      %235 = arith.mulf %229, %233 : vector<8x128xf32>
      %236 = arith.addf %234, %235 : vector<8x128xf32>
      %237 = math.tanh %236 : vector<8x128xf32>
      %238 = arith.mulf %231, %237 : vector<8x128xf32>
      %239 = vector.broadcast %217 : i32 to vector<8x128xi32>
      %240 = arith.cmpi sgt, %17, %239 : vector<8x128xi32>
      %241 = arith.select %240, %236, %213 : vector<8x128xi1>, vector<8x128xf32>
      %242 = arith.truncf %238 : vector<8x128xf32> to vector<8x128xbf16>
      %243 = arith.select %240, %242, %215 : vector<8x128xi1>, vector<8x128xbf16>
      %c0_76 = arith.constant 0 : index
      %c0_77 = arith.constant 0 : index
      %244 = vector.load %arg10[%c0_76, %c0_77] : memref<8x128xbf16, #tpu.memory_space<vmem>>, vector<8x128xbf16>
      tpu.vector_store %arg10[%c0_76, %c0_77], %243 {strides = array<i32>} : memref<8x128xbf16, #tpu.memory_space<vmem>>, vector<8x128xbf16>,
      %c0_78 = arith.constant 0 : index
      %c0_79 = arith.constant 0 : index
      %245 = vector.load %arg11[%c0_78, %c0_79] : memref<8x128xf32, #tpu.memory_space<vmem>>, vector<8x128xf32>
      tpu.vector_store %arg11[%c0_78, %c0_79], %241 {strides = array<i32>} : memref<8x128xf32, #tpu.memory_space<vmem>>, vector<8x128xf32>,
    } else {
    }
    %c0_i32_2 = arith.constant 0 : i32
    %8 = arith.cmpi eq, %arg0, %c0_i32_2 : i32
    %9 = arith.extui %8 : i1 to i32
    %c0_i32_3 = arith.constant 0 : i32
    %10 = arith.cmpi ne, %9, %c0_i32_3 : i32
    scf.if %10 {
      %c0_4 = arith.constant 0 : index
      %c0_5 = arith.constant 0 : index
      %11 = vector.load %arg10[%c0_4, %c0_5] : memref<8x128xbf16, #tpu.memory_space<vmem>>, vector<8x128xbf16>
      %c0_6 = arith.constant 0 : index
      %c0_7 = arith.constant 0 : index
      %12 = vector.load %arg7[%c0_6, %c0_7] : memref<128x128xbf16, #tpu.memory_space<vmem>>, vector<128x128xbf16>
      %cst = arith.constant dense<0.000000e+00> : vector<8x128xf32>
      %13 = tpu.matmul %11, %12, %cst {dimension_numbers = #tpu.dot_dimension_numbers<[1], [0], [0], [1], [0, 0, 1, 1], [], []>} : vector<8x128xbf16>, vector<128x128xbf16>, vector<8x128xf32> -> vector<8x128xf32>
      %c0_8 = arith.constant 0 : index
      %c0_9 = arith.constant 0 : index
      %14 = vector.load %arg8[%c0_8, %c0_9] : memref<8x128xf32, #tpu.memory_space<vmem>>, vector<8x128xf32>
      %15 = arith.addf %13, %14 : vector<8x128xf32>
      %c0_10 = arith.constant 0 : index
      %c0_11 = arith.constant 0 : index
      %16 = vector.load %arg9[%c0_10, %c0_11] : memref<8x128xf32, #tpu.memory_space<vmem>>, vector<8x128xf32>
      tpu.vector_store %arg9[%c0_10, %c0_11], %15 {strides = array<i32>} : memref<8x128xf32, #tpu.memory_space<vmem>>, vector<8x128xf32>,
    } else {
    }
    return
  }
  func.func @transform_0(%arg0: i32, %arg1: memref<1xi32, #tpu.memory_space<smem>>) -> (i32, i32) {
    %c0 = arith.constant 0 : index
    %0 = memref.load %arg1[%c0] : memref<1xi32, #tpu.memory_space<smem>>
    %c7_i32 = arith.constant 7 : i32
    %1 = arith.addi %0, %c7_i32 : i32
    %c8_i32 = arith.constant 8 : i32
    %2 = arith.divsi %1, %c8_i32 : i32
    %c1_i32 = arith.constant 1 : i32
    %3 = arith.subi %2, %c1_i32 : i32
    %c0_i32 = arith.constant 0 : i32
    %4 = arith.maxsi %3, %c0_i32 : i32
    %5 = arith.minsi %arg0, %4 : i32
    %c0_i32_0 = arith.constant 0 : i32
    %c0_i32_1 = arith.constant 0 : i32
    return %5, %c0_i32_0 : i32, i32
  }
  func.func @transform_1(%arg0: i32, %arg1: memref<1xi32, #tpu.memory_space<smem>>) -> (i32, i32) {
    %c0_i32 = arith.constant 0 : i32
    %c0_i32_0 = arith.constant 0 : i32
    %c0_i32_1 = arith.constant 0 : i32
    return %c0_i32, %c0_i32_0 : i32, i32
  }
  func.func @transform_2(%arg0: i32, %arg1: memref<1xi32, #tpu.memory_space<smem>>) -> (i32, i32) {
    %c0_i32 = arith.constant 0 : i32
    %c0_i32_0 = arith.constant 0 : i32
    %c0_i32_1 = arith.constant 0 : i32
    return %c0_i32, %c0_i32_0 : i32, i32
  }
  func.func @transform_3(%arg0: i32, %arg1: memref<1xi32, #tpu.memory_space<smem>>) -> (i32, i32) {
    %c0_i32 = arith.constant 0 : i32
    %c0_i32_0 = arith.constant 0 : i32
    %c0_i32_1 = arith.constant 0 : i32
    return %c0_i32, %c0_i32_0 : i32, i32
  }
  func.func @transform_4(%arg0: i32, %arg1: memref<1xi32, #tpu.memory_space<smem>>) -> (i32, i32) {
    %c0_i32 = arith.constant 0 : i32
    %c0_i32_0 = arith.constant 0 : i32
    %c0_i32_1 = arith.constant 0 : i32
    return %c0_i32, %c0_i32_0 : i32, i32
  }
  func.func @transform_5(%arg0: i32, %arg1: memref<1xi32, #tpu.memory_space<smem>>) -> (i32, i32) {
    %c0_i32 = arith.constant 0 : i32
    %c0_i32_0 = arith.constant 0 : i32
    %c0_i32_1 = arith.constant 0 : i32
    return %c0_i32, %c0_i32_0 : i32, i32
  }
  func.func @transform_6(%arg0: i32, %arg1: memref<1xi32, #tpu.memory_space<smem>>) -> (i32, i32) {
    %c0_i32 = arith.constant 0 : i32
    %c0_i32_0 = arith.constant 0 : i32
    %c0_i32_1 = arith.constant 0 : i32
    return %c0_i32, %c0_i32_0 : i32, i32
  }
  func.func @transform_7(%arg0: i32, %arg1: memref<1xi32, #tpu.memory_space<smem>>) -> (i32, i32) {
    %c0_i32 = arith.constant 0 : i32
    %c0_i32_0 = arith.constant 0 : i32
    %c0_i32_1 = arith.constant 0 : i32
    return %c0_i32, %c0_i32_0 : i32, i32
  }
}

</mosaic_0001>

<bundles_post_ra>
// kernel: tpu_custom_call.1
= control target key start
LH: loop header
LB: loop body
LE: loop exit
PB: predicated region body
PF: predicated region fallthrough
CT: control target
= control target key end

     0   :  { %14 = vsyncpa [#allocation8], 0  ;;  %s3008_s0 = inlined_call_operand.<no memory space> [shape: s32[1], index: 0, kind: input, shape index: {}]   ;;  %s3009_s1 = inlined_call_operand.hbm [shape: bf16[64,128], index: 1, kind: input, shape index: {}]   ;;  %s3010_s2 = inlined_call_operand.hbm [shape: s32[8,128], index: 2, kind: input, shape index: {}]   ;;  %s3011_s3 = inlined_call_operand.hbm [shape: bf16[128,512], index: 3, kind: input, shape index: {}]   ;;  %s3012_s4 = inlined_call_operand.hbm [shape: bf16[128,512], index: 4, kind: input, shape index: {}]   ;;  %s3013_s5 = inlined_call_operand.hbm [shape: f32[64,512], index: 5, kind: input, shape index: {}]   ;;  %s3014_s6 = inlined_call_operand.hbm [shape: bf16[128,128], index: 6, kind: input, shape index: {}]   ;;  %s3015_s7 = inlined_call_operand.vmem [shape: f32[8,128], index: 7, kind: input, shape index: {}]   ;;  %s3016_s8 = inlined_call_operand.hbm [shape: f32[8,128], index: 8, kind: output, shape index: {}]  }
   0x1   :  { %15 = vsyncpa [#allocation11], 0 }
   0x2   :  { %16 = vsyncpa [#allocation14], 0 }
   0x3   :  { %17 = vsyncpa [#allocation17], 0 }
   0x4   :  { %18 = vsyncpa [#allocation9], 0  ;;  %s2338_s27 = smov [#allocation10]  }
   0x5   :  { %s53_s28 = sshll.u32 %s2338_s27, 4  ;;  %s54_s28 = int_to_ptr.vmem [resolvable:$true] %s53_s28 }
   0x6   :  { %s2194_s29 = scalar_lea.vmem %s54_s28, 128  ;;  %p2199_p1 = scmp.lt.s32.totalorder %s54_s28, %s54_s28 }
   0x7   :  { %p2195_p0 = scmp.ne.s32.totalorder %s54_s28, %s2194_s29  ;;  %p2200_p2 = scmp.lt.s32.totalorder %s2194_s29, %s2194_s29 }
   0x9   :  { %p2201_p3 = por %p2200_p2, %p2199_p1 }
   0xb   :  { %p2202_p4 = pnand %p2201_p3, %p2195_p0 }
   0xd   :  { %2205 = shalt.err (!%p2202_p4)
}
   0xe   :  { %56 = dma.hbm_to_vmem [thread:$0]  %s3010_s2, 128, %s54_s28, [#allocation11]  }
   0xf   :  { %s2339_s10 = smov [#allocation13]   ;;  %s22_s14 = sadd.s32 7, %s3008_s0 }
  0x10   :  { %s74_s11 = sshll.u32 %s2339_s10, 4  ;;  %p23_p5 = scmp.lt.s32.totalorder %s22_s14, 0  ;;  %s75_s11 = int_to_ptr.vmem [resolvable:$true] %s74_s11 }
  0x11   :  { %s2214_s15 = scalar_lea.vmem %s75_s11, 4096  ;;  %p2219_p7 = scmp.lt.s32.totalorder %s75_s11, %s75_s11 }
  0x12   :  { %p2215_p6 = scmp.ne.s32.totalorder %s75_s11, %s2214_s15  ;;  %p2220_p8 = scmp.lt.s32.totalorder %s2214_s15, %s2214_s15 }
  0x14   :  { %p2221_p9 = por %p2220_p8, %p2219_p7 }
  0x16   :  { %p2222_p10 = pnand %p2221_p9, %p2215_p6 }
  0x18   :  { %2225 = shalt.err (!%p2222_p10)
}
  0x19   :  { %s2340_s16 = smov 256   ;;  %s2341_s17 = smov 16  }
  0x1a   :  { %80 = dma.hbm_to_vmem [thread:$0]  %s3012_s4, 4096, %s75_s11, [#allocation14], %s2340_s16, %s2340_s16, %s2341_s17  }
  0x1b   :  { %s24_s2 = ssub.s32 0, %s22_s14  ;;  %s2342_s21 = smov [#allocation7]  }
  0x1c   :  { %s1832_s20 = smin.u32 %s24_s2, %s22_s14  ;;  %s40_s22 = sshll.u32 %s2342_s21, 4  ;;  %s2409_s22 = int_to_ptr.vmem [resolvable:$true] %s40_s22 }
  0x1d   :  { %s26_s23 = sshrl.u32 %s1832_s20, 3  ;;  %s2343_s26 = smov [#allocation12]  }
  0x1e   :  { %s27_s24 = ssub.s32 0, %s26_s23  ;;  %s62_s27 = sshll.u32 %s2343_s26, 4  ;;  %s63_s27 = int_to_ptr.vmem [resolvable:$true] %s62_s27 }
  0x1f   :  { %s3069_s24 = smov (!%p23_p5, %s27_s24), %s26_s23  ;;  %s2234_s29 = scalar_lea.vmem %s63_s27, 4096 }
  0x20   :  { %s1833_s25 = sadd.s32 4294967295, %s3069_s24  ;;  %p2235_p12 = scmp.ne.s32.totalorder %s63_s27, %s2234_s29 }
  0x21   :  { %p2412_p11 = scmp.gt.s32.totalorder %s1833_s25, 0  ;;  %p2239_p13 = scmp.lt.s32.totalorder %s63_s27, %s63_s27 }
  0x22   :  { %p2240_p0 = scmp.lt.s32.totalorder %s2234_s29, %s2234_s29 }
  0x24   :  { %p2241_p1 = por %p2240_p0, %p2239_p13 }
  0x26   :  { %p2242_p2 = pnand %p2241_p1, %p2235_p12 }
  0x28   :  { %2245 = shalt.err (!%p2242_p2)
}
  0x29   :  { %68 = dma.hbm_to_vmem [thread:$0]  %s3011_s3, 4096, %s63_s27, [#allocation11], %s2340_s16, %s2340_s16, %s2341_s17  }
  0x2a   :  { %s3071_s25 = smov (!%p2412_p11, %s1833_s25), 0  ;;  %s2344_s9 = smov [#allocation15]  }
  0x2b   :  { %s3073_s25 = smov (%p2412_p11, %s3071_s25), 0  ;;  %s86_s10 = sshll.u32 %s2344_s9, 4  ;;  %s2423_s10 = int_to_ptr.vmem [resolvable:$true] %s86_s10 }
  0x2c   :  { %s1918_s11 = sshll.u32 %s3073_s25, 9  ;;  %s2248_s2 = scalar_lea.hbm %s3009_s1, 512 }
  0x2d   :  { %s39_s14 = scalar_lea.hbm %s3009_s1, %s1918_s11 }
  0x2e   :  { %s2246_s15 = scalar_lea.hbm %s39_s14, 512  ;;  %p2249_p4 = scmp.lt.s32.totalorder %s39_s14, %s3009_s1 }
  0x2f   :  { %p2247_p3 = scmp.ne.s32.totalorder %s39_s14, %s2246_s15  ;;  %p2250_p5 = scmp.lt.s32.totalorder %s2248_s2, %s2246_s15 }
  0x31   :  { %p2251_p6 = por %p2250_p5, %p2249_p4 }
  0x33   :  { %p2252_p7 = pnand %p2251_p6, %p2247_p3 }
  0x35   :  { %2255 = shalt.err (!%p2252_p7)
}
  0x36   :  { %s2256_s17 = scalar_lea.vmem %s2409_s22, 512  ;;  %p2261_p9 = scmp.lt.s32.totalorder %s2409_s22, %s2409_s22 }
  0x37   :  { %p2257_p8 = scmp.ne.s32.totalorder %s2409_s22, %s2256_s17  ;;  %p2262_p10 = scmp.lt.s32.totalorder %s2256_s17, %s2256_s17 }
  0x39   :  { %p2263_p11 = por %p2262_p10, %p2261_p9 }
  0x3b   :  { %p2264_p12 = pnand %p2263_p11, %p2257_p8 }
  0x3d   :  { %2267 = shalt.err (!%p2264_p12)
}
  0x3e   :  { %s2345_s20 = smov 64   ;;  %s2346_s1 = smov 4  }
  0x3f   :  { %46 = dma.hbm_to_vmem [thread:$0]  %s39_s14, 512, %s2409_s22, [#allocation8], %s2345_s20, %s2345_s20, %s2346_s1  }
  0x40   :  { %s2276_s21 = scalar_lea.vmem %s2423_s10, 4096  ;;  %p2281_p0 = scmp.lt.s32.totalorder %s2423_s10, %s2423_s10 }
  0x41   :  { %p2277_p13 = scmp.ne.s32.totalorder %s2423_s10, %s2276_s21  ;;  %p2282_p1 = scmp.lt.s32.totalorder %s2276_s21, %s2276_s21 }
  0x43   :  { %p2283_p2 = por %p2282_p1, %p2281_p0 }
  0x45   :  { %p2284_p3 = pnand %p2283_p2, %p2277_p13 }
  0x47   :  { %2287 = shalt.err (!%p2284_p3)
}
  0x48   :  { %s2347_s23 = smov 512   ;;  %s2348_s24 = smov 32  }
  0x49   :  { %92 = dma.hbm_to_vmem [thread:$0]  %s3013_s5, 4096, %s2423_s10, [#allocation14], %s2347_s23, %s2347_s23, %s2348_s24  }
  0x4a   :  { %s2349_s27 = smov [#allocation16]  }
  0x4b   :  { %s98_s28 = sshll.u32 %s2349_s27, 4  ;;  %s99_s28 = int_to_ptr.vmem [resolvable:$true] %s98_s28 }
  0x4c   :  { %s2296_s29 = scalar_lea.vmem %s99_s28, 1024  ;;  %p2301_p5 = scmp.lt.s32.totalorder %s99_s28, %s99_s28 }
  0x4d   :  { %p2297_p4 = scmp.ne.s32.totalorder %s99_s28, %s2296_s29  ;;  %p2302_p6 = scmp.lt.s32.totalorder %s2296_s29, %s2296_s29 }
  0x4f   :  { %p2303_p7 = por %p2302_p6, %p2301_p5 }
  0x51   :  { %p2304_p8 = pnand %p2303_p7, %p2297_p4 }
  0x53   :  { %2307 = shalt.err (!%p2304_p8)
}
  0x54   :  { %104 = dma.hbm_to_vmem [thread:$0]  %s3014_s6, 1024, %s99_s28, [#allocation17], %s2345_s20, %s2345_s20, %s2346_s1  }
  0x55   :  { %2328 = dma.done.wait [#allocation8], 512  }
  0x56   :  { %2329 = vsyncadd [#allocation8], 4294966784 }
  0x57   :  { %2330 = dma.done.wait [#allocation11], 4224  }
  0x58   :  { %2331 = vsyncadd [#allocation11], 4294963072 }
  0x59   :  { %2332 = dma.done.wait [#allocation14], 8192  }
  0x5a   :  { %2333 = vsyncadd [#allocation14], 4294959104 }
  0x5b   :  { %2334 = dma.done.wait [#allocation17], 1024  }
  0x5c   :  { %2335 = vsyncadd [#allocation17], 4294966272  ;;  %v2350_v0 = vmov 0   ;;  %v3017_v1 = vmov 0.0   ;;  %p1838_p9 = scmp.le.s32.totalorder %s3008_s0, 0 }
  0x5d   :  { %145 = vst [vmem:[#allocation2] sm:$0xf] %v2350_v0  ;;  %146 = vst [vmem:[#allocation3] sm:$0xff] %v3017_v1 }
  0x5e   :  { %151 = sbr.rel (%p1838_p9) target bundleno = 2086 (0x826), region = 61 }
  0x63   :  { %v1965_v2 = vld [vmem:[#allocation12 + $0xe4] ss:$16 sps:$4 sm:$0xff]   ;;  %v1967_v3 = vld [vmem:[#allocation12 + $0xec] ss:$16 sps:$4 sm:$0xff]   ;;  %v3019_v4 = vmov 0  }
  0x64   :  { %440 = vmatprep.mubr.bf16.mxu0 %v3019_v4  ;;  %513 = vmatprep.mubr.bf16.mxu1 %v3019_v4  ;;  %v1969_v5 = vld [vmem:[#allocation12 + $0xe0] ss:$16 sps:$4 sm:$0xff]   ;;  %v1970_v6 = vld [vmem:[#allocation12 + $0xe8] ss:$16 sps:$4 sm:$0xff]   ;;  %v1971_v7 = vld [vmem:[#allocation12 + $0xc4] ss:$16 sps:$4 sm:$0xff]  }
  0x65   :  { %408 = vmatprep.subr.bf16.mxu0 %v1965_v2  ;;  %481 = vmatprep.subr.bf16.mxu1 %v1967_v3  ;;  %v1973_v8 = vld [vmem:[#allocation12 + $0xcc] ss:$16 sps:$4 sm:$0xff]   ;;  %v1975_v9 = vld [vmem:[#allocation12 + $0xc0] ss:$16 sps:$4 sm:$0xff]   ;;  %v1976_v10 = vld [vmem:[#allocation12 + $0xc8] ss:$16 sps:$4 sm:$0xff]  }
  0x66   :  { %409 = vmatpush1.bf16.msra.mxu0 %v1969_v5  ;;  %482 = vmatpush1.bf16.msra.mxu1 %v1970_v6  ;;  %v1977_v11 = vld [vmem:[#allocation12 + $0xa4] ss:$16 sps:$4 sm:$0xff]   ;;  %v1979_v12 = vld [vmem:[#allocation12 + $0xac] ss:$16 sps:$4 sm:$0xff]   ;;  %v1981_v13 = vld [vmem:[#allocation12 + $0xa0] ss:$16 sps:$4 sm:$0xff]  }
  0x67   :  { %410 = vmatprep.subr.bf16.mxu0 %v1971_v7  ;;  %483 = vmatprep.subr.bf16.mxu1 %v1973_v8  ;;  %v1982_v14 = vld [vmem:[#allocation12 + $0xa8] ss:$16 sps:$4 sm:$0xff]   ;;  %v1983_v15 = vld [vmem:[#allocation12 + $0x84] ss:$16 sps:$4 sm:$0xff]   ;;  %v1985_v16 = vld [vmem:[#allocation12 + $0x8c] ss:$16 sps:$4 sm:$0xff]  }
  0x68   :  { %v1987_v17 = vld [vmem:[#allocation12 + $0x80] ss:$16 sps:$4 sm:$0xff]   ;;  %v1988_v18 = vld [vmem:[#allocation12 + $0x88] ss:$16 sps:$4 sm:$0xff]   ;;  %v1989_v19 = vld [vmem:[#allocation12 + $0x64] ss:$16 sps:$4 sm:$0xff]  }
  0x69   :  { %v1991_v20 = vld [vmem:[#allocation12 + $0x6c] ss:$16 sps:$4 sm:$0xff]   ;;  %v1993_v21 = vld [vmem:[#allocation12 + $0x60] ss:$16 sps:$4 sm:$0xff]   ;;  %v1994_v22 = vld [vmem:[#allocation12 + $0x68] ss:$16 sps:$4 sm:$0xff]  }
  0x6a   :  { %411 = vmatpush1.bf16.msra.mxu0 %v1975_v9  ;;  %484 = vmatpush1.bf16.msra.mxu1 %v1976_v10  ;;  %v1995_v23 = vld [vmem:[#allocation12 + $0x44] ss:$16 sps:$4 sm:$0xff]   ;;  %v1997_v24 = vld [vmem:[#allocation12 + $0x4c] ss:$16 sps:$4 sm:$0xff]   ;;  %v1999_v25 = vld [vmem:[#allocation12 + $0x40] ss:$16 sps:$4 sm:$0xff]  }
  0x6b   :  { %412 = vmatprep.subr.bf16.mxu0 %v1977_v11  ;;  %485 = vmatprep.subr.bf16.mxu1 %v1979_v12  ;;  %v2000_v26 = vld [vmem:[#allocation12 + $0x48] ss:$16 sps:$4 sm:$0xff]   ;;  %v2001_v27 = vld [vmem:[#allocation12 + $0x24] ss:$16 sps:$4 sm:$0xff]   ;;  %v2003_v28 = vld [vmem:[#allocation12 + $0x2c] ss:$16 sps:$4 sm:$0xff]  }
  0x6c   :  { %v2005_v29 = vld [vmem:[#allocation12 + $0x20] ss:$16 sps:$4 sm:$0xff]   ;;  %v2006_v30 = vld [vmem:[#allocation12 + $0x28] ss:$16 sps:$4 sm:$0xff]   ;;  %v2007_v31 = vld [vmem:[#allocation12 + $0x4] ss:$16 sps:$4 sm:$0xff]  }
  0x6d   :  { %v2009_v32 = vld [vmem:[#allocation12 + $0xc] ss:$16 sps:$4 sm:$0xff]   ;;  %v2011_v33 = vld [vmem:[#allocation12] ss:$16 sps:$4 sm:$0xff]   ;;  %v2012_v34 = vld [vmem:[#allocation12 + $0x8] ss:$16 sps:$4 sm:$0xff]  }
  0x6e   :  { %413 = vmatpush1.bf16.msra.mxu0 %v1981_v13  ;;  %486 = vmatpush1.bf16.msra.mxu1 %v1982_v14  ;;  %v2456_v35 = vld [vmem:[#allocation13 + $0xe4] ss:$16 sps:$4 sm:$0xff]   ;;  %v2458_v36 = vld [vmem:[#allocation13 + $0xec] ss:$16 sps:$4 sm:$0xff]   ;;  %v2460_v38 = vld [vmem:[#allocation13 + $0xe0] ss:$16 sps:$4 sm:$0xff]  }
  0x6f   :  { %414 = vmatprep.subr.bf16.mxu0 %v1983_v15  ;;  %487 = vmatprep.subr.bf16.mxu1 %v1985_v16  ;;  %v2013_v37 = vld [vmem:[#allocation7] sm:$0xff]   ;;  %v2466_v40 = vld [vmem:[#allocation13 + $0xc4] ss:$16 sps:$4 sm:$0xff]   ;;  %v2470_v42 = vld [vmem:[#allocation13 + $0xc0] ss:$16 sps:$4 sm:$0xff]  }
  0x70   :  { %v2462_v39 = vld [vmem:[#allocation13 + $0xe8] ss:$16 sps:$4 sm:$0xff]   ;;  %v2468_v41 = vld [vmem:[#allocation13 + $0xcc] ss:$16 sps:$4 sm:$0xff]   ;;  %v2478_v44 = vld [vmem:[#allocation13 + $0xa4] ss:$16 sps:$4 sm:$0xff]  }
  0x71   :  { %v2474_v43 = vld [vmem:[#allocation13 + $0xc8] ss:$16 sps:$4 sm:$0xff]   ;;  %v2480_v45 = vld [vmem:[#allocation13 + $0xac] ss:$16 sps:$4 sm:$0xff]   ;;  %v2026_v46 = vld [vmem:[#allocation7 + $0x8] sm:$0xff]  }
  0x72   :  { %415 = vmatpush1.bf16.msra.mxu0 %v1987_v17  ;;  %488 = vmatpush1.bf16.msra.mxu1 %v1988_v18  ;;  %v2484_v47 = vld [vmem:[#allocation13 + $0xa0] ss:$16 sps:$4 sm:$0xff]   ;;  %v2486_v48 = vld [vmem:[#allocation13 + $0xa8] ss:$16 sps:$4 sm:$0xff]   ;;  %v2490_v49 = vld [vmem:[#allocation13 + $0x84] ss:$16 sps:$4 sm:$0xff]  }
  0x73   :  { %416 = vmatprep.subr.bf16.mxu0 %v1989_v19  ;;  %489 = vmatprep.subr.bf16.mxu1 %v1991_v20  ;;  %v2494_v50 = vld [vmem:[#allocation13 + $0x8c] ss:$16 sps:$4 sm:$0xff]   ;;  %v2496_v51 = vld [vmem:[#allocation13 + $0x80] ss:$16 sps:$4 sm:$0xff]   ;;  %v2498_v52 = vld [vmem:[#allocation13 + $0x88] ss:$16 sps:$4 sm:$0xff]  }
  0x74   :  { %v2502_v53 = vld [vmem:[#allocation13 + $0x64] ss:$16 sps:$4 sm:$0xff]   ;;  %v2506_v54 = vld [vmem:[#allocation13 + $0x6c] ss:$16 sps:$4 sm:$0xff]   ;;  %v2512_v56 = vld [vmem:[#allocation13 + $0x60] ss:$16 sps:$4 sm:$0xff]  }
  0x75   :  { %v2039_v55 = vld [vmem:[#allocation7 + $0x10] sm:$0xff]   ;;  %v2518_v58 = vld [vmem:[#allocation13 + $0x44] ss:$16 sps:$4 sm:$0xff]   ;;  %v2524_v60 = vld [vmem:[#allocation13 + $0x40] ss:$16 sps:$4 sm:$0xff]  }
  0x76   :  { %417 = vmatpush1.bf16.msra.mxu0 %v1993_v21  ;;  %490 = vmatpush1.bf16.msra.mxu1 %v1994_v22  ;;  %v2514_v57 = vld [vmem:[#allocation13 + $0x68] ss:$16 sps:$4 sm:$0xff]   ;;  %v2520_v59 = vld [vmem:[#allocation13 + $0x4c] ss:$16 sps:$4 sm:$0xff]   ;;  %v2530_v62 = vld [vmem:[#allocation13 + $0x24] ss:$16 sps:$4 sm:$0xff]  }
  0x77   :  { %418 = vmatprep.subr.bf16.mxu0 %v1995_v23  ;;  %491 = vmatprep.subr.bf16.mxu1 %v1997_v24  ;;  %v2526_v61 = vld [vmem:[#allocation13 + $0x48] ss:$16 sps:$4 sm:$0xff]   ;;  %v2532_v63 = vld [vmem:[#allocation13 + $0x2c] ss:$16 sps:$4 sm:$0xff]   ;;  %v2052_v0 = vld [vmem:[#allocation7 + $0x18] sm:$0xff]  }
  0x78   :  { %v2538_v2 = vld [vmem:[#allocation13 + $0x20] ss:$16 sps:$4 sm:$0xff]   ;;  %v2540_v3 = vld [vmem:[#allocation13 + $0x28] ss:$16 sps:$4 sm:$0xff]   ;;  %v2544_v5 = vld [vmem:[#allocation13 + $0x4] ss:$16 sps:$4 sm:$0xff]  }
  0x79   :  { %v2546_v6 = vld [vmem:[#allocation13 + $0xc] ss:$16 sps:$4 sm:$0xff]   ;;  %v2550_v7 = vld [vmem:[#allocation13] ss:$16 sps:$4 sm:$0xff]   ;;  %v2552_v8 = vld [vmem:[#allocation13 + $0x8] ss:$16 sps:$4 sm:$0xff]  }
  0x7a   :  { %419 = vmatpush1.bf16.msra.mxu0 %v1999_v25  ;;  %492 = vmatpush1.bf16.msra.mxu1 %v2000_v26  ;;  %v2560_v9 = vld [vmem:[#allocation2] sm:$0xf] }
  0x7b   :  { %420 = vmatprep.subr.bf16.mxu0 %v2001_v27  ;;  %493 = vmatprep.subr.bf16.mxu1 %v2003_v28 }
  0x7e   :  { %421 = vmatpush1.bf16.msra.mxu0 %v2005_v29  ;;  %494 = vmatpush1.bf16.msra.mxu1 %v2006_v30 }
  0x7f   :  { %422 = vmatprep.subr.bf16.mxu0 %v2007_v31  ;;  %495 = vmatprep.subr.bf16.mxu1 %v2009_v32 }
  0x82   :  { %423 = vmatpush1.bf16.msra.mxu0 %v2011_v33  ;;  %496 = vmatpush1.bf16.msra.mxu1 %v2012_v34 }
  0x83   :  { %785 = vmatprep.subr.bf16.mxu0 %v2456_v35  ;;  %826 = vmatprep.subr.bf16.mxu1 %v2458_v36 }
  0x85   :  { %441 = vmatmul.mubr.bf16.vlgmr.msra.gmra.mxu0 %v2013_v37  ;;  %514 = vmatmul.mubr.bf16.vlgmr.msra.gmra.mxu1 %v2013_v37 }
  0x86   :  { %786 = vmatpush1.bf16.msra.mxu0 %v2460_v38  ;;  %827 = vmatpush1.bf16.msra.mxu1 %v2462_v39 }
  0x87   :  { %787 = vmatprep.subr.bf16.mxu0 %v2466_v40  ;;  %828 = vmatprep.subr.bf16.mxu1 %v2468_v41 }
  0x88   :  { %450 = vmatprep.mubr.bf16.mxu0 %v3019_v4  ;;  %523 = vmatprep.mubr.bf16.mxu1 %v3019_v4 }
  0x8a   :  { %788 = vmatpush1.bf16.msra.mxu0 %v2470_v42  ;;  %829 = vmatpush1.bf16.msra.mxu1 %v2474_v43 }
  0x8b   :  { %789 = vmatprep.subr.bf16.mxu0 %v2478_v44  ;;  %830 = vmatprep.subr.bf16.mxu1 %v2480_v45 }
  0x8d   :  { %451 = vmatmul.mubr.bf16.gmra.mxu0 %v2026_v46  ;;  %524 = vmatmul.mubr.bf16.gmra.mxu1 %v2026_v46 }
  0x8e   :  { %790 = vmatpush1.bf16.msra.mxu0 %v2484_v47  ;;  %831 = vmatpush1.bf16.msra.mxu1 %v2486_v48 }
  0x8f   :  { %791 = vmatprep.subr.bf16.mxu0 %v2490_v49  ;;  %832 = vmatprep.subr.bf16.mxu1 %v2494_v50 }
  0x90   :  { %460 = vmatprep.mubr.bf16.mxu0 %v3019_v4  ;;  %533 = vmatprep.mubr.bf16.mxu1 %v3019_v4 }
  0x92   :  { %792 = vmatpush1.bf16.msra.mxu0 %v2496_v51  ;;  %833 = vmatpush1.bf16.msra.mxu1 %v2498_v52 }
  0x93   :  { %793 = vmatprep.subr.bf16.mxu0 %v2502_v53  ;;  %834 = vmatprep.subr.bf16.mxu1 %v2506_v54 }
  0x95   :  { %461 = vmatmul.mubr.bf16.gmra.mxu0 %v2039_v55  ;;  %534 = vmatmul.mubr.bf16.gmra.mxu1 %v2039_v55 }
  0x96   :  { %794 = vmatpush1.bf16.msra.mxu0 %v2512_v56  ;;  %835 = vmatpush1.bf16.msra.mxu1 %v2514_v57 }
  0x97   :  { %795 = vmatprep.subr.bf16.mxu0 %v2518_v58  ;;  %836 = vmatprep.subr.bf16.mxu1 %v2520_v59 }
  0x98   :  { %470 = vmatprep.mubr.bf16.mxu0 %v3019_v4  ;;  %543 = vmatprep.mubr.bf16.mxu1 %v3019_v4 }
  0x9a   :  { %796 = vmatpush1.bf16.msra.mxu0 %v2524_v60  ;;  %837 = vmatpush1.bf16.msra.mxu1 %v2526_v61 }
  0x9b   :  { %797 = vmatprep.subr.bf16.mxu0 %v2530_v62  ;;  %838 = vmatprep.subr.bf16.mxu1 %v2532_v63 }
  0x9d   :  { %471 = vmatmul.mubr.bf16.gmra.mxu0 %v2052_v0  ;;  %544 = vmatmul.mubr.bf16.gmra.mxu1 %v2052_v0  ;;  %v192_v0 = vld [vmem:[#allocation15] sm:$0xff] }
  0x9e   :  { %798 = vmatpush1.bf16.msra.mxu0 %v2538_v2  ;;  %839 = vmatpush1.bf16.msra.mxu1 %v2540_v3 }
  0x9f   :  { %799 = vmatprep.subr.bf16.mxu0 %v2544_v5  ;;  %840 = vmatprep.subr.bf16.mxu1 %v2546_v6 }
  0xa0   :  { %817 = vmatprep.mubr.bf16.mxu0 %v3019_v4  ;;  %858 = vmatprep.mubr.bf16.mxu1 %v3019_v4 }
  0xa2   :  { %800 = vmatpush1.bf16.msra.mxu0 %v2550_v7  ;;  %841 = vmatpush1.bf16.msra.mxu1 %v2552_v8 }
  0xa3   :  { %900 = vmatprep.subr.bf16.mxu0 %v2456_v35  ;;  %941 = vmatprep.subr.bf16.mxu1 %v2458_v36 }
  0xa5   :  { %818 = vmatmul.mubr.bf16.vlgmr.msra.gmra.mxu0 %v2560_v9  ;;  %859 = vmatmul.mubr.bf16.vlgmr.msra.gmra.mxu1 %v2560_v9 }
  0xa6   :  { %901 = vmatpush1.bf16.msra.mxu0 %v2460_v38  ;;  %942 = vmatpush1.bf16.msra.mxu1 %v2462_v39 }
  0xa7   :  { %902 = vmatprep.subr.bf16.mxu0 %v2466_v40  ;;  %943 = vmatprep.subr.bf16.mxu1 %v2468_v41 }
  0xa8   :  { %932 = vmatprep.mubr.bf16.mxu0 %v3019_v4  ;;  %973 = vmatprep.mubr.bf16.mxu1 %v3019_v4 }
  0xaa   :  { %903 = vmatpush1.bf16.msra.mxu0 %v2470_v42  ;;  %944 = vmatpush1.bf16.msra.mxu1 %v2474_v43 }
  0xab   :  { %904 = vmatprep.subr.bf16.mxu0 %v2478_v44  ;;  %945 = vmatprep.subr.bf16.mxu1 %v2480_v45 }
  0xae   :  { %905 = vmatpush1.bf16.msra.mxu0 %v2484_v47  ;;  %946 = vmatpush1.bf16.msra.mxu1 %v2486_v48 }
  0xaf   :  { %906 = vmatprep.subr.bf16.mxu0 %v2490_v49  ;;  %947 = vmatprep.subr.bf16.mxu1 %v2494_v50 }
  0xb2   :  { %907 = vmatpush1.bf16.msra.mxu0 %v2496_v51  ;;  %948 = vmatpush1.bf16.msra.mxu1 %v2498_v52 }
  0xb3   :  { %908 = vmatprep.subr.bf16.mxu0 %v2502_v53  ;;  %949 = vmatprep.subr.bf16.mxu1 %v2506_v54 }
  0xb6   :  { %909 = vmatpush1.bf16.msra.mxu0 %v2512_v56  ;;  %950 = vmatpush1.bf16.msra.mxu1 %v2514_v57 }
  0xb7   :  { %910 = vmatprep.subr.bf16.mxu0 %v2518_v58  ;;  %951 = vmatprep.subr.bf16.mxu1 %v2520_v59 }
  0xba   :  { %911 = vmatpush1.bf16.msra.mxu0 %v2524_v60  ;;  %952 = vmatpush1.bf16.msra.mxu1 %v2526_v61 }
  0xbb   :  { %912 = vmatprep.subr.bf16.mxu0 %v2530_v62  ;;  %953 = vmatprep.subr.bf16.mxu1 %v2532_v63 }
  0xbe   :  { %913 = vmatpush1.bf16.msra.mxu0 %v2538_v2  ;;  %954 = vmatpush1.bf16.msra.mxu1 %v2540_v3 }
  0xbf   :  { %914 = vmatprep.subr.bf16.mxu0 %v2544_v5  ;;  %955 = vmatprep.subr.bf16.mxu1 %v2546_v6 }
  0xc2   :  { %915 = vmatpush1.bf16.msra.mxu0 %v2550_v7  ;;  %956 = vmatpush1.bf16.msra.mxu1 %v2552_v8 }
  0xc3   :  { %1015 = vmatprep.subr.bf16.mxu0 %v2456_v35  ;;  %1056 = vmatprep.subr.bf16.mxu1 %v2458_v36 }
 0x145   :  { %v442_v10 = vpop.f32.mrf.mxu0  ;;  %v515_v11 = vpop.f32.mrf.mxu1 }
 0x147   :  { %v444_v12 = vpop.f32.mrf.mxu0  ;;  %v517_v13 = vpop.f32.mrf.mxu1 }
 0x149   :  { %v2600_v14 = vpop.f32.mrf.mxu0  ;;  %v2602_v15 = vpop.f32.mrf.mxu1 }
 0x14b   :  { %v2604_v16 = vpop.f32.mrf.mxu0  ;;  %v2606_v17 = vpop.f32.mrf.mxu1 }
 0x14d   :  { %v2608_v18 = vpop.f32.mrf.mxu0  ;;  %v2610_v19 = vpop.f32.mrf.mxu1 }
 0x14e   :  { %3022 = vst [vmem:[#allocation24_spill] sm:$0xff] %v2610_v19 }
 0x14f   :  { %v2612_v20 = vpop.f32.mrf.mxu0  ;;  %v2614_v21 = vpop.f32.mrf.mxu1 }
 0x150   :  { %3023 = vst [vmem:[#allocation25_spill] sm:$0xff] %v2614_v21 }
 0x151   :  { %v2616_v22 = vpop.f32.mrf.mxu0  ;;  %v2618_v23 = vpop.f32.mrf.mxu1 }
 0x152   :  { %3024 = vst [vmem:[#allocation26_spill] sm:$0xff] %v2616_v22  ;;  %3025 = vst [vmem:[#allocation27_spill] sm:$0xff] %v2618_v23 }
 0x153   :  { %v2620_v24 = vpop.f32.mrf.mxu0  ;;  %v2622_v25 = vpop.f32.mrf.mxu1 }
 0x154   :  { %3026 = vst [vmem:[#allocation28_spill] sm:$0xff] %v2620_v24  ;;  %3027 = vst [vmem:[#allocation29_spill] sm:$0xff] %v2622_v25 }
 0x155   :  { %v2624_v26 = vpop.f32.mrf.mxu0  ;;  %v2626_v27 = vpop.f32.mrf.mxu1 }
 0x156   :  { %3028 = vst [vmem:[#allocation30_spill] sm:$0xff] %v2624_v26  ;;  %3029 = vst [vmem:[#allocation31_spill] sm:$0xff] %v2626_v27 }
 0x157   :  { %v2628_v28 = vpop.f32.mrf.mxu0  ;;  %v2630_v29 = vpop.f32.mrf.mxu1 }
 0x158   :  { %3030 = vst [vmem:[#allocation32_spill] sm:$0xff] %v2628_v28  ;;  %3031 = vst [vmem:[#allocation33_spill] sm:$0xff] %v2630_v29 }
 0x159   :  { %v2632_v30 = vpop.f32.mrf.mxu0  ;;  %v2634_v31 = vpop.f32.mrf.mxu1 }
 0x15a   :  { %3032 = vst [vmem:[#allocation34_spill] sm:$0xff] %v2632_v30  ;;  %3033 = vst [vmem:[#allocation35_spill] sm:$0xff] %v2634_v31  ;;  %v193_v30 = vld [vmem:[#allocation15 + $0x8] sm:$0xff] }
 0x15b   :  { %v2636_v32 = vpop.f32.mrf.mxu0  ;;  %v2638_v33 = vpop.f32.mrf.mxu1 }
 0x15c   :  { %3034 = vst [vmem:[#allocation36_spill] sm:$0xff] %v2636_v32  ;;  %3035 = vst [vmem:[#allocation37_spill] sm:$0xff] %v2638_v33  ;;  %v443_v32 = vadd.f32 %v442_v10, %v192_v0 }
 0x15d   :  { %v2640_v34 = vpop.f32.mrf.mxu0  ;;  %v2642_v37 = vpop.f32.mrf.mxu1 }
 0x15e   :  { %3036 = vst [vmem:[#allocation38_spill] sm:$0xff] %v2640_v34  ;;  %3037 = vst [vmem:[#allocation39_spill] sm:$0xff] %v2642_v37  ;;  %v445_v34 = vadd.f32 %v444_v12, %v193_v30  ;;  %v195_v37 = vld [vmem:[#allocation15 + $0x18] sm:$0xff] }
 0x15f   :  { %v2644_v46 = vpop.f32.mrf.mxu0  ;;  %v2646_v55 = vpop.f32.mrf.mxu1 }
 0x160   :  { %3038 = vst [vmem:[#allocation40_spill] sm:$0xff] %v2644_v46  ;;  %3039 = vst [vmem:[#allocation41_spill] sm:$0xff] %v2646_v55 }
 0x161   :  { %v2648_v1 = vpop.f32.mrf.mxu0  ;;  %v2650_v4 = vpop.f32.mrf.mxu1 }
 0x162   :  { %3040 = vst [vmem:[#allocation42_spill] sm:$0xff] %v2648_v1  ;;  %3041 = vst [vmem:[#allocation43_spill] sm:$0xff] %v2650_v4  ;;  %v518_v1 = vadd.f32 %v517_v13, %v195_v37  ;;  %v197_v37 = vld [vmem:[#allocation15 + $0x28] sm:$0xff] }
 0x163   :  { %v2652_v27 = vpop.f32.mrf.mxu0  ;;  %v2654_v31 = vpop.f32.mrf.mxu1 }
 0x164   :  { %3042 = vst [vmem:[#allocation44_spill] sm:$0xff] %v2652_v27  ;;  %3043 = vst [vmem:[#allocation45_spill] sm:$0xff] %v2654_v31  ;;  %v194_v31 = vld [vmem:[#allocation15 + $0x10] sm:$0xff] }
 0x165   :  { %v819_v33 = vpop.f32.mrf.mxu0  ;;  %v860_v29 = vpop.f32.mrf.mxu1  ;;  %v516_v10 = vadd.f32 %v515_v11, %v194_v31 }
 0x166   :  { %v867_v28 = vadd.f32 %v819_v33, %v443_v32 }
 0x167   :  { %v821_v26 = vpop.f32.mrf.mxu0  ;;  %v862_v46 = vpop.f32.mrf.mxu1  ;;  %v869_v0 = vadd.f32 %v860_v29, %v516_v10 }
 0x168   :  { %v871_v23 = vmul.f32 0.5, %v867_v28  ;;  %v868_v55 = vadd.f32 %v821_v26, %v445_v34  ;;  %v870_v27 = vadd.f32 %v862_v46, %v518_v1  ;;  %v3044_v34 = vmov 0  }
 0x169   :  { %v823_v25 = vpop.f32.mrf.mxu0  ;;  %v864_v24 = vpop.f32.mrf.mxu1  ;;  %v873_v12 = vmul.f32 0.5, %v869_v0 }
 0x16a   :  { %2065 = vtanh.f32 %v871_v23  ;;  %v872_v4 = vmul.f32 0.5, %v868_v55  ;;  %v2656_v25 = vld [vmem:[#allocation3] sm:$0xff]  ;;  %v2662_v24 = vld [vmem:[#allocation10] sm:$0xff] }
 0x16b   :  { %v824_v22 = vpop.f32.mrf.mxu0  ;;  %v865_v19 = vpop.f32.mrf.mxu1  ;;  %vm890_vm0 = vcmp.gt.s32.totalorder %v2662_v24, 0  ;;  %v199_v55 = vld [vmem:[#allocation15 + $0x38] sm:$0xff]  ;;  %vm1005_vm2 = vcmp.gt.s32.totalorder %v2662_v24, 1  ;;  %vm1120_vm4 = vcmp.gt.s32.totalorder %v2662_v24, 2  ;;  %vm1235_vm6 = vcmp.gt.s32.totalorder %v2662_v24, 3 }
 0x16c   :  { %2067 = vtanh.f32 %v872_v4  ;;  %vm893_vm1 = vmpackc.low %vm890_vm0, %vm890_vm0  ;;  %vm1350_vm8 = vcmp.gt.s32.totalorder %v2662_v24, 4  ;;  %vm1465_vm10 = vcmp.gt.s32.totalorder %v2662_v24, 5  ;;  %vm1580_vm12 = vcmp.gt.s32.totalorder %v2662_v24, 6  ;;  %v223_v24 = vld [vmem:[#allocation15 + $0xf8] sm:$0xff] }
 0x16d   :  { %2069 = vtanh.f32 %v870_v27  ;;  %vm1008_vm3 = vmpackc.low %vm1005_vm2, %vm1005_vm2 }
 0x16e   :  { %2071 = vtanh.f32 %v873_v12  ;;  %v449_v12 = vadd.f32 %v2604_v16, %v197_v37  ;;  %vm1123_vm5 = vmpackc.low %vm1120_vm4, %vm1120_vm4 }
 0x16f   :  { %vm1238_vm7 = vmpackc.low %vm1235_vm6, %vm1235_vm6 }
 0x170   :  { %vm1353_vm9 = vmpackc.low %vm1350_vm8, %vm1350_vm8 }
 0x171   :  { %vm1468_vm11 = vmpackc.low %vm1465_vm10, %vm1465_vm10 }
 0x172   :  { %vm1583_vm13 = vmpackc.low %vm1580_vm12, %vm1580_vm12 }
 0x177   :  { %v2066_v30 = vpop.eup %2065 }
 0x178   :  { %v877_v32 = vmul.f32 0.5, %v2066_v30 }
 0x179   :  { %v2068_v33 = vpop.eup %2067 }
 0x17a   :  { %v880_v21 = vadd.f32 0.5, %v877_v32  ;;  %v878_v26 = vmul.f32 0.5, %v2068_v33  ;;  %v2070_v23 = vpop.eup %2069 }
 0x17b   :  { %v2072_v1 = vpop.eup %2071 }
 0x17c   :  { %v881_v13 = vadd.f32 0.5, %v878_v26  ;;  %v885_v19 = vmul.f32 %v2070_v23, %v880_v21  ;;  %v879_v11 = vmul.f32 0.5, %v2072_v1  ;;  %v522_v26 = vadd.f32 %v2606_v17, %v199_v55 }
 0x17e   :  { %v884_v22 = vmul.f32 %v881_v13, %v2656_v25  ;;  %v882_v27 = vadd.f32 0.5, %v879_v11 }
 0x180   :  { %v2659_v4 = vadd.f32 %v885_v19, %v884_v22 }
 0x182   :  { %2073 = vtanh.f32 %v2659_v4 }
 0x18f   :  { %v2074_v28 = vpop.eup %2073 }
 0x190   :  { %v888_v29 = vmul.f32 %v2074_v28, %v882_v27 }
 0x192   :  { %v892_v31 = vpack.c.bf16 %v888_v29, %v888_v29 }
 0x194   :  { %v2669_v21 = vsel %vm893_vm1, %v892_v31, %v2560_v9  ;;  %v196_v9 = vld [vmem:[#allocation15 + $0x20] sm:$0xff] }
 0x195   :  { %933 = vmatmul.mubr.bf16.vlgmr.msra.gmra.mxu0 %v2669_v21  ;;  %974 = vmatmul.mubr.bf16.vlgmr.msra.gmra.mxu1 %v2669_v21  ;;  %v447_v46 = vadd.f32 %v2600_v14, %v196_v9  ;;  %v198_v14 = vld [vmem:[#allocation15 + $0x30] sm:$0xff] }
 0x196   :  { %1016 = vmatpush1.bf16.msra.mxu0 %v2460_v38  ;;  %1057 = vmatpush1.bf16.msra.mxu1 %v2462_v39  ;;  %v520_v29 = vadd.f32 %v2602_v15, %v198_v14 }
 0x197   :  { %1017 = vmatprep.subr.bf16.mxu0 %v2466_v40  ;;  %1058 = vmatprep.subr.bf16.mxu1 %v2468_v41 }
 0x198   :  { %1047 = vmatprep.mubr.bf16.mxu0 %v3044_v34  ;;  %1088 = vmatprep.mubr.bf16.mxu1 %v3044_v34 }
 0x19a   :  { %1018 = vmatpush1.bf16.msra.mxu0 %v2470_v42  ;;  %1059 = vmatpush1.bf16.msra.mxu1 %v2474_v43 }
 0x19b   :  { %1019 = vmatprep.subr.bf16.mxu0 %v2478_v44  ;;  %1060 = vmatprep.subr.bf16.mxu1 %v2480_v45 }
 0x19e   :  { %1020 = vmatpush1.bf16.msra.mxu0 %v2484_v47  ;;  %1061 = vmatpush1.bf16.msra.mxu1 %v2486_v48 }
 0x19f   :  { %1021 = vmatprep.subr.bf16.mxu0 %v2490_v49  ;;  %1062 = vmatprep.subr.bf16.mxu1 %v2494_v50 }
 0x1a2   :  { %1022 = vmatpush1.bf16.msra.mxu0 %v2496_v51  ;;  %1063 = vmatpush1.bf16.msra.mxu1 %v2498_v52 }
 0x1a3   :  { %1023 = vmatprep.subr.bf16.mxu0 %v2502_v53  ;;  %1064 = vmatprep.subr.bf16.mxu1 %v2506_v54 }
 0x1a6   :  { %1024 = vmatpush1.bf16.msra.mxu0 %v2512_v56  ;;  %1065 = vmatpush1.bf16.msra.mxu1 %v2514_v57 }
 0x1a7   :  { %1025 = vmatprep.subr.bf16.mxu0 %v2518_v58  ;;  %1066 = vmatprep.subr.bf16.mxu1 %v2520_v59 }
 0x1aa   :  { %1026 = vmatpush1.bf16.msra.mxu0 %v2524_v60  ;;  %1067 = vmatpush1.bf16.msra.mxu1 %v2526_v61 }
 0x1ab   :  { %1027 = vmatprep.subr.bf16.mxu0 %v2530_v62  ;;  %1068 = vmatprep.subr.bf16.mxu1 %v2532_v63 }
 0x1ae   :  { %1028 = vmatpush1.bf16.msra.mxu0 %v2538_v2  ;;  %1069 = vmatpush1.bf16.msra.mxu1 %v2540_v3 }
 0x1af   :  { %1029 = vmatprep.subr.bf16.mxu0 %v2544_v5  ;;  %1070 = vmatprep.subr.bf16.mxu1 %v2546_v6 }
 0x1b2   :  { %1030 = vmatpush1.bf16.msra.mxu0 %v2550_v7  ;;  %1071 = vmatpush1.bf16.msra.mxu1 %v2552_v8 }
 0x1b3   :  { %1130 = vmatprep.subr.bf16.mxu0 %v2456_v35  ;;  %1171 = vmatprep.subr.bf16.mxu1 %v2458_v36 }
 0x255   :  { %v934_v10 = vpop.f32.mrf.mxu0  ;;  %v975_v0 = vpop.f32.mrf.mxu1 }
 0x256   :  { %v982_v30 = vadd.f32 %v934_v10, %v447_v46  ;;  %v984_v16 = vadd.f32 %v975_v0, %v520_v29 }
 0x257   :  { %v936_v32 = vpop.f32.mrf.mxu0  ;;  %v977_v33 = vpop.f32.mrf.mxu1 }
 0x258   :  { %v986_v13 = vmul.f32 0.5, %v982_v30  ;;  %v983_v23 = vadd.f32 %v936_v32, %v449_v12  ;;  %v985_v11 = vadd.f32 %v977_v33, %v522_v26  ;;  %v988_v31 = vmul.f32 0.5, %v984_v16 }
 0x259   :  { %v938_v22 = vpop.f32.mrf.mxu0  ;;  %v979_v19 = vpop.f32.mrf.mxu1  ;;  %v891_v32 = vsel %vm890_vm0, %v2659_v4, %v2656_v25  ;;  %v200_v25 = vld [vmem:[#allocation15 + $0x40] sm:$0xff]  ;;  %v201_v4 = vld [vmem:[#allocation15 + $0x48] sm:$0xff] }
 0x25a   :  { %2075 = vtanh.f32 %v986_v13  ;;  %v987_v1 = vmul.f32 0.5, %v983_v23  ;;  %v455_v29 = vadd.f32 %v2612_v20, %v201_v4 }
 0x25b   :  { %v939_v27 = vpop.f32.mrf.mxu0  ;;  %v980_v28 = vpop.f32.mrf.mxu1 }
 0x25c   :  { %2077 = vtanh.f32 %v987_v1  ;;  %v203_v27 = vld [vmem:[#allocation15 + $0x58] sm:$0xff] }
 0x25d   :  { %2079 = vtanh.f32 %v985_v11 }
 0x25e   :  { %2081 = vtanh.f32 %v988_v31 }
 0x267   :  { %v2076_v9 = vpop.eup %2075 }
 0x268   :  { %v992_v37 = vmul.f32 0.5, %v2076_v9 }
 0x269   :  { %v2078_v46 = vpop.eup %2077 }
 0x26a   :  { %v995_v17 = vadd.f32 0.5, %v992_v37  ;;  %v993_v55 = vmul.f32 0.5, %v2078_v46  ;;  %v2080_v10 = vpop.eup %2079  ;;  %v3045_v37 = vld [vmem:[#allocation25_spill] sm:$0xff] }
 0x26b   :  { %v2082_v26 = vpop.eup %2081  ;;  %v528_v46 = vadd.f32 %v3045_v37, %v203_v27 }
 0x26c   :  { %v996_v12 = vadd.f32 0.5, %v993_v55  ;;  %v1000_v30 = vmul.f32 %v2080_v10, %v995_v17  ;;  %v994_v13 = vmul.f32 0.5, %v2082_v26  ;;  %v3046_v26 = vld [vmem:[#allocation24_spill] sm:$0xff] }
 0x26e   :  { %v999_v33 = vmul.f32 %v996_v12, %v891_v32  ;;  %v997_v23 = vadd.f32 0.5, %v994_v13 }
 0x270   :  { %v1001_v15 = vadd.f32 %v1000_v30, %v999_v33 }
 0x272   :  { %2083 = vtanh.f32 %v1001_v15  ;;  %v2716_v0 = vsel %vm1005_vm2, %v1001_v15, %v891_v32 }
 0x27f   :  { %v2084_v22 = vpop.eup %2083 }
 0x280   :  { %v1003_v19 = vmul.f32 %v2084_v22, %v997_v23 }
 0x282   :  { %v1007_v1 = vpack.c.bf16 %v1003_v19, %v1003_v19 }
 0x284   :  { %v2719_v11 = vsel %vm1008_vm3, %v1007_v1, %v2669_v21  ;;  %v453_v21 = vadd.f32 %v2608_v18, %v200_v25  ;;  %v202_v18 = vld [vmem:[#allocation15 + $0x50] sm:$0xff] }
 0x285   :  { %1048 = vmatmul.mubr.bf16.vlgmr.msra.gmra.mxu0 %v2719_v11  ;;  %1089 = vmatmul.mubr.bf16.vlgmr.msra.gmra.mxu1 %v2719_v11  ;;  %v526_v13 = vadd.f32 %v3046_v26, %v202_v18  ;;  %v3048_v18 = vld [vmem:[#allocation28_spill] sm:$0xff] }
 0x286   :  { %1131 = vmatpush1.bf16.msra.mxu0 %v2460_v38  ;;  %1172 = vmatpush1.bf16.msra.mxu1 %v2462_v39 }
 0x287   :  { %1132 = vmatprep.subr.bf16.mxu0 %v2466_v40  ;;  %1173 = vmatprep.subr.bf16.mxu1 %v2468_v41 }
 0x288   :  { %1162 = vmatprep.mubr.bf16.mxu0 %v3044_v34  ;;  %1203 = vmatprep.mubr.bf16.mxu1 %v3044_v34 }
 0x28a   :  { %1133 = vmatpush1.bf16.msra.mxu0 %v2470_v42  ;;  %1174 = vmatpush1.bf16.msra.mxu1 %v2474_v43 }
 0x28b   :  { %1134 = vmatprep.subr.bf16.mxu0 %v2478_v44  ;;  %1175 = vmatprep.subr.bf16.mxu1 %v2480_v45 }
 0x28e   :  { %1135 = vmatpush1.bf16.msra.mxu0 %v2484_v47  ;;  %1176 = vmatpush1.bf16.msra.mxu1 %v2486_v48 }
 0x28f   :  { %1136 = vmatprep.subr.bf16.mxu0 %v2490_v49  ;;  %1177 = vmatprep.subr.bf16.mxu1 %v2494_v50 }
 0x292   :  { %1137 = vmatpush1.bf16.msra.mxu0 %v2496_v51  ;;  %1178 = vmatpush1.bf16.msra.mxu1 %v2498_v52 }
 0x293   :  { %1138 = vmatprep.subr.bf16.mxu0 %v2502_v53  ;;  %1179 = vmatprep.subr.bf16.mxu1 %v2506_v54 }
 0x296   :  { %1139 = vmatpush1.bf16.msra.mxu0 %v2512_v56  ;;  %1180 = vmatpush1.bf16.msra.mxu1 %v2514_v57 }
 0x297   :  { %1140 = vmatprep.subr.bf16.mxu0 %v2518_v58  ;;  %1181 = vmatprep.subr.bf16.mxu1 %v2520_v59 }
 0x29a   :  { %1141 = vmatpush1.bf16.msra.mxu0 %v2524_v60  ;;  %1182 = vmatpush1.bf16.msra.mxu1 %v2526_v61 }
 0x29b   :  { %1142 = vmatprep.subr.bf16.mxu0 %v2530_v62  ;;  %1183 = vmatprep.subr.bf16.mxu1 %v2532_v63 }
 0x29e   :  { %1143 = vmatpush1.bf16.msra.mxu0 %v2538_v2  ;;  %1184 = vmatpush1.bf16.msra.mxu1 %v2540_v3 }
 0x29f   :  { %1144 = vmatprep.subr.bf16.mxu0 %v2544_v5  ;;  %1185 = vmatprep.subr.bf16.mxu1 %v2546_v6 }
 0x2a2   :  { %1145 = vmatpush1.bf16.msra.mxu0 %v2550_v7  ;;  %1186 = vmatpush1.bf16.msra.mxu1 %v2552_v8 }
 0x2a3   :  { %1245 = vmatprep.subr.bf16.mxu0 %v2456_v35  ;;  %1286 = vmatprep.subr.bf16.mxu1 %v2458_v36 }
 0x345   :  { %v1049_v28 = vpop.f32.mrf.mxu0  ;;  %v1090_v14 = vpop.f32.mrf.mxu1 }
 0x346   :  { %v1097_v16 = vadd.f32 %v1049_v28, %v453_v21  ;;  %v1099_v20 = vadd.f32 %v1090_v14, %v526_v13 }
 0x347   :  { %v1051_v31 = vpop.f32.mrf.mxu0  ;;  %v1092_v9 = vpop.f32.mrf.mxu1 }
 0x348   :  { %v1101_v17 = vmul.f32 0.5, %v1097_v16  ;;  %v1098_v55 = vadd.f32 %v1051_v31, %v455_v29  ;;  %v1100_v32 = vadd.f32 %v1092_v9, %v528_v46  ;;  %v1103_v23 = vmul.f32 0.5, %v1099_v20 }
 0x349   :  { %v1053_v10 = vpop.f32.mrf.mxu0  ;;  %v1094_v12 = vpop.f32.mrf.mxu1 }
 0x34a   :  { %2085 = vtanh.f32 %v1101_v17  ;;  %v1102_v30 = vmul.f32 0.5, %v1098_v55  ;;  %v3047_v12 = vld [vmem:[#allocation26_spill] sm:$0xff] }
 0x34b   :  { %v1054_v33 = vpop.f32.mrf.mxu0  ;;  %v1095_v15 = vpop.f32.mrf.mxu1 }
 0x34c   :  { %2087 = vtanh.f32 %v1102_v30 }
 0x34d   :  { %2089 = vtanh.f32 %v1100_v32  ;;  %v207_v32 = vld [vmem:[#allocation15 + $0x78] sm:$0xff] }
 0x34e   :  { %2091 = vtanh.f32 %v1103_v23 }
 0x357   :  { %v2086_v22 = vpop.eup %2085 }
 0x358   :  { %v1107_v19 = vmul.f32 0.5, %v2086_v22  ;;  %v3049_v22 = vld [vmem:[#allocation29_spill] sm:$0xff] }
 0x359   :  { %v2088_v1 = vpop.eup %2087 }
 0x35a   :  { %v1110_v25 = vadd.f32 0.5, %v1107_v19  ;;  %v1108_v4 = vmul.f32 0.5, %v2088_v1  ;;  %v2090_v21 = vpop.eup %2089  ;;  %v532_v19 = vadd.f32 %v3049_v22, %v207_v32 }
 0x35b   :  { %v2092_v14 = vpop.eup %2091 }
 0x35c   :  { %v1111_v27 = vadd.f32 0.5, %v1108_v4  ;;  %v1115_v28 = vmul.f32 %v2090_v21, %v1110_v25  ;;  %v1109_v9 = vmul.f32 0.5, %v2092_v14 }
 0x35e   :  { %v1114_v29 = vmul.f32 %v1111_v27, %v2716_v0  ;;  %v1112_v37 = vadd.f32 0.5, %v1109_v9 }
 0x360   :  { %v1116_v16 = vadd.f32 %v1115_v28, %v1114_v29  ;;  %v206_v29 = vld [vmem:[#allocation15 + $0x70] sm:$0xff] }
 0x362   :  { %2093 = vtanh.f32 %v1116_v16  ;;  %v2764_v31 = vsel %vm1120_vm4, %v1116_v16, %v2716_v0  ;;  %v204_v0 = vld [vmem:[#allocation15 + $0x60] sm:$0xff] }
 0x363   :  { %v457_v30 = vadd.f32 %v3047_v12, %v204_v0  ;;  %v3050_v16 = vld [vmem:[#allocation27_spill] sm:$0xff] }
 0x364   :  { %v530_v14 = vadd.f32 %v3050_v16, %v206_v29 }
 0x36f   :  { %v2094_v46 = vpop.eup %2093 }
 0x370   :  { %v1118_v17 = vmul.f32 %v2094_v46, %v1112_v37 }
 0x372   :  { %v1122_v55 = vpack.c.bf16 %v1118_v17, %v1118_v17 }
 0x374   :  { %v2767_v10 = vsel %vm1123_vm5, %v1122_v55, %v2719_v11  ;;  %v205_v11 = vld [vmem:[#allocation15 + $0x68] sm:$0xff] }
 0x375   :  { %1163 = vmatmul.mubr.bf16.vlgmr.msra.gmra.mxu0 %v2767_v10  ;;  %1204 = vmatmul.mubr.bf16.vlgmr.msra.gmra.mxu1 %v2767_v10  ;;  %v459_v26 = vadd.f32 %v3048_v18, %v205_v11 }
 0x376   :  { %1246 = vmatpush1.bf16.msra.mxu0 %v2460_v38  ;;  %1287 = vmatpush1.bf16.msra.mxu1 %v2462_v39 }
 0x377   :  { %1247 = vmatprep.subr.bf16.mxu0 %v2466_v40  ;;  %1288 = vmatprep.subr.bf16.mxu1 %v2468_v41 }
 0x378   :  { %1277 = vmatprep.mubr.bf16.mxu0 %v3044_v34  ;;  %1318 = vmatprep.mubr.bf16.mxu1 %v3044_v34 }
 0x37a   :  { %1248 = vmatpush1.bf16.msra.mxu0 %v2470_v42  ;;  %1289 = vmatpush1.bf16.msra.mxu1 %v2474_v43 }
 0x37b   :  { %1249 = vmatprep.subr.bf16.mxu0 %v2478_v44  ;;  %1290 = vmatprep.subr.bf16.mxu1 %v2480_v45 }
 0x37e   :  { %1250 = vmatpush1.bf16.msra.mxu0 %v2484_v47  ;;  %1291 = vmatpush1.bf16.msra.mxu1 %v2486_v48 }
 0x37f   :  { %1251 = vmatprep.subr.bf16.mxu0 %v2490_v49  ;;  %1292 = vmatprep.subr.bf16.mxu1 %v2494_v50 }
 0x382   :  { %1252 = vmatpush1.bf16.msra.mxu0 %v2496_v51  ;;  %1293 = vmatpush1.bf16.msra.mxu1 %v2498_v52 }
 0x383   :  { %1253 = vmatprep.subr.bf16.mxu0 %v2502_v53  ;;  %1294 = vmatprep.subr.bf16.mxu1 %v2506_v54 }
 0x386   :  { %1254 = vmatpush1.bf16.msra.mxu0 %v2512_v56  ;;  %1295 = vmatpush1.bf16.msra.mxu1 %v2514_v57 }
 0x387   :  { %1255 = vmatprep.subr.bf16.mxu0 %v2518_v58  ;;  %1296 = vmatprep.subr.bf16.mxu1 %v2520_v59 }
 0x38a   :  { %1256 = vmatpush1.bf16.msra.mxu0 %v2524_v60  ;;  %1297 = vmatpush1.bf16.msra.mxu1 %v2526_v61 }
 0x38b   :  { %1257 = vmatprep.subr.bf16.mxu0 %v2530_v62  ;;  %1298 = vmatprep.subr.bf16.mxu1 %v2532_v63 }
 0x38e   :  { %1258 = vmatpush1.bf16.msra.mxu0 %v2538_v2  ;;  %1299 = vmatpush1.bf16.msra.mxu1 %v2540_v3 }
 0x38f   :  { %1259 = vmatprep.subr.bf16.mxu0 %v2544_v5  ;;  %1300 = vmatprep.subr.bf16.mxu1 %v2546_v6 }
 0x392   :  { %1260 = vmatpush1.bf16.msra.mxu0 %v2550_v7  ;;  %1301 = vmatpush1.bf16.msra.mxu1 %v2552_v8 }
 0x393   :  { %1360 = vmatprep.subr.bf16.mxu0 %v2456_v35  ;;  %1401 = vmatprep.subr.bf16.mxu1 %v2458_v36 }
 0x435   :  { %v1164_v33 = vpop.f32.mrf.mxu0  ;;  %v1205_v15 = vpop.f32.mrf.mxu1 }
 0x436   :  { %v1212_v13 = vadd.f32 %v1164_v33, %v457_v30  ;;  %v1214_v9 = vadd.f32 %v1205_v15, %v530_v14 }
 0x437   :  { %v1166_v20 = vpop.f32.mrf.mxu0  ;;  %v1207_v23 = vpop.f32.mrf.mxu1 }
 0x438   :  { %v1216_v1 = vmul.f32 0.5, %v1212_v13  ;;  %v1213_v25 = vadd.f32 %v1166_v20, %v459_v26  ;;  %v1215_v21 = vadd.f32 %v1207_v23, %v532_v19  ;;  %v1218_v37 = vmul.f32 0.5, %v1214_v9 }
 0x439   :  { %v1168_v4 = vpop.f32.mrf.mxu0  ;;  %v1209_v35 = vpop.f32.mrf.mxu1 }
 0x43a   :  { %2095 = vtanh.f32 %v1216_v1  ;;  %v1217_v36 = vmul.f32 0.5, %v1213_v25  ;;  %v210_v35 = vld [vmem:[#allocation15 + $0x90] sm:$0xff] }
 0x43b   :  { %v1169_v27 = vpop.f32.mrf.mxu0  ;;  %v1210_v28 = vpop.f32.mrf.mxu1 }
 0x43c   :  { %2097 = vtanh.f32 %v1217_v36  ;;  %v3054_v36 = vld [vmem:[#allocation31_spill] sm:$0xff] }
 0x43d   :  { %2099 = vtanh.f32 %v1215_v21  ;;  %v536_v21 = vadd.f32 %v3054_v36, %v210_v35 }
 0x43e   :  { %2101 = vtanh.f32 %v1218_v37 }
 0x447   :  { %v2096_v46 = vpop.eup %2095 }
 0x448   :  { %v1222_v17 = vmul.f32 0.5, %v2096_v46 }
 0x449   :  { %v2098_v55 = vpop.eup %2097 }
 0x44a   :  { %v1225_v0 = vadd.f32 0.5, %v1222_v17  ;;  %v1223_v11 = vmul.f32 0.5, %v2098_v55  ;;  %v2100_v12 = vpop.eup %2099 }
 0x44b   :  { %v2102_v15 = vpop.eup %2101 }
 0x44c   :  { %v1226_v30 = vadd.f32 0.5, %v1223_v11  ;;  %v1230_v32 = vmul.f32 %v2100_v12, %v1225_v0  ;;  %v1224_v13 = vmul.f32 0.5, %v2102_v15 }
 0x44e   :  { %v1229_v33 = vmul.f32 %v1226_v30, %v2764_v31  ;;  %v1227_v20 = vadd.f32 0.5, %v1224_v13 }
 0x450   :  { %v1231_v18 = vadd.f32 %v1230_v32, %v1229_v33 }
 0x452   :  { %2103 = vtanh.f32 %v1231_v18  ;;  %v2812_v26 = vsel %vm1235_vm6, %v1231_v18, %v2764_v31 }
 0x45f   :  { %v2104_v23 = vpop.eup %2103 }
 0x460   :  { %v1233_v22 = vmul.f32 %v2104_v23, %v1227_v20  ;;  %v2871_v23 = vld [vmem:[#allocation13 + $0xe0] ss:$16 sps:$4 sm:$0xff]  }
 0x462   :  { %v1237_v19 = vpack.c.bf16 %v1233_v22, %v1233_v22  ;;  %v2877_v22 = vld [vmem:[#allocation13 + $0xc4] ss:$16 sps:$4 sm:$0xff]  }
 0x464   :  { %v2815_v1 = vsel %vm1238_vm7, %v1237_v19, %v2767_v10  ;;  %v2880_v19 = vld [vmem:[#allocation13 + $0xcc] ss:$16 sps:$4 sm:$0xff]  }
 0x465   :  { %1278 = vmatmul.mubr.bf16.vlgmr.msra.gmra.mxu0 %v2815_v1  ;;  %1319 = vmatmul.mubr.bf16.vlgmr.msra.gmra.mxu1 %v2815_v1 }
 0x466   :  { %1361 = vmatpush1.bf16.msra.mxu0 %v2460_v38  ;;  %1402 = vmatpush1.bf16.msra.mxu1 %v2462_v39  ;;  %v2851_v38 = vld [vmem:[#allocation13 + $0xe4] ss:$16 sps:$4 sm:$0xff]   ;;  %v2854_v39 = vld [vmem:[#allocation13 + $0xec] ss:$16 sps:$4 sm:$0xff]  }
 0x467   :  { %1362 = vmatprep.subr.bf16.mxu0 %v2466_v40  ;;  %1403 = vmatprep.subr.bf16.mxu1 %v2468_v41  ;;  %v208_v40 = vld [vmem:[#allocation15 + $0x80] sm:$0xff]  ;;  %v209_v41 = vld [vmem:[#allocation15 + $0x88] sm:$0xff] }
 0x468   :  { %1392 = vmatprep.mubr.bf16.mxu0 %v3044_v34  ;;  %1433 = vmatprep.mubr.bf16.mxu1 %v3044_v34 }
 0x46a   :  { %1363 = vmatpush1.bf16.msra.mxu0 %v2470_v42  ;;  %1404 = vmatpush1.bf16.msra.mxu1 %v2474_v43  ;;  %v3051_v42 = vld [vmem:[#allocation30_spill] sm:$0xff] }
 0x46b   :  { %1364 = vmatprep.subr.bf16.mxu0 %v2478_v44  ;;  %1405 = vmatprep.subr.bf16.mxu1 %v2480_v45  ;;  %v463_v43 = vadd.f32 %v3051_v42, %v208_v40  ;;  %v211_v44 = vld [vmem:[#allocation15 + $0x98] sm:$0xff] }
 0x46c   :  { %v2888_v40 = vld [vmem:[#allocation13 + $0xc8] ss:$16 sps:$4 sm:$0xff]   ;;  %v2894_v42 = vld [vmem:[#allocation13 + $0xac] ss:$16 sps:$4 sm:$0xff]  }
 0x46e   :  { %1365 = vmatpush1.bf16.msra.mxu0 %v2484_v47  ;;  %1406 = vmatpush1.bf16.msra.mxu1 %v2486_v48  ;;  %v3052_v48 = vld [vmem:[#allocation32_spill] sm:$0xff] }
 0x46f   :  { %1366 = vmatprep.subr.bf16.mxu0 %v2490_v49  ;;  %1407 = vmatprep.subr.bf16.mxu1 %v2494_v50  ;;  %v465_v49 = vadd.f32 %v3052_v48, %v209_v41  ;;  %v2891_v41 = vld [vmem:[#allocation13 + $0xa4] ss:$16 sps:$4 sm:$0xff]   ;;  %v2909_v48 = vld [vmem:[#allocation13 + $0x80] ss:$16 sps:$4 sm:$0xff]  }
 0x472   :  { %1367 = vmatpush1.bf16.msra.mxu0 %v2496_v51  ;;  %1408 = vmatpush1.bf16.msra.mxu1 %v2498_v52 }
 0x473   :  { %1368 = vmatprep.subr.bf16.mxu0 %v2502_v53  ;;  %1409 = vmatprep.subr.bf16.mxu1 %v2506_v54  ;;  %v3053_v53 = vld [vmem:[#allocation33_spill] sm:$0xff] }
 0x474   :  { %v538_v54 = vadd.f32 %v3053_v53, %v211_v44  ;;  %v2900_v44 = vld [vmem:[#allocation13 + $0xa8] ss:$16 sps:$4 sm:$0xff]  }
 0x475   :  { %v2924_v53 = vld [vmem:[#allocation13 + $0x68] ss:$16 sps:$4 sm:$0xff]  }
 0x476   :  { %1369 = vmatpush1.bf16.msra.mxu0 %v2512_v56  ;;  %1410 = vmatpush1.bf16.msra.mxu1 %v2514_v57 }
 0x477   :  { %1370 = vmatprep.subr.bf16.mxu0 %v2518_v58  ;;  %1411 = vmatprep.subr.bf16.mxu1 %v2520_v59 }
 0x47a   :  { %1371 = vmatpush1.bf16.msra.mxu0 %v2524_v60  ;;  %1412 = vmatpush1.bf16.msra.mxu1 %v2526_v61 }
 0x47b   :  { %1372 = vmatprep.subr.bf16.mxu0 %v2530_v62  ;;  %1413 = vmatprep.subr.bf16.mxu1 %v2532_v63 }
 0x47e   :  { %1373 = vmatpush1.bf16.msra.mxu0 %v2538_v2  ;;  %1414 = vmatpush1.bf16.msra.mxu1 %v2540_v3 }
 0x47f   :  { %1374 = vmatprep.subr.bf16.mxu0 %v2544_v5  ;;  %1415 = vmatprep.subr.bf16.mxu1 %v2546_v6 }
 0x482   :  { %1375 = vmatpush1.bf16.msra.mxu0 %v2550_v7  ;;  %1416 = vmatpush1.bf16.msra.mxu1 %v2552_v8 }
 0x483   :  { %1475 = vmatprep.subr.bf16.mxu0 %v2851_v38  ;;  %1516 = vmatprep.subr.bf16.mxu1 %v2854_v39 }
 0x525   :  { %v1279_v45 = vpop.f32.mrf.mxu0  ;;  %v1320_v47 = vpop.f32.mrf.mxu1 }
 0x526   :  { %v1327_v50 = vadd.f32 %v1279_v45, %v463_v43  ;;  %v1329_v27 = vadd.f32 %v1320_v47, %v536_v21  ;;  %v2897_v43 = vld [vmem:[#allocation13 + $0xa0] ss:$16 sps:$4 sm:$0xff]   ;;  %v2903_v45 = vld [vmem:[#allocation13 + $0x84] ss:$16 sps:$4 sm:$0xff]   ;;  %v2906_v47 = vld [vmem:[#allocation13 + $0x8c] ss:$16 sps:$4 sm:$0xff]  }
 0x527   :  { %v1281_v51 = vpop.f32.mrf.mxu0  ;;  %v1322_v52 = vpop.f32.mrf.mxu1 }
 0x528   :  { %v1331_v56 = vmul.f32 0.5, %v1327_v50  ;;  %v1328_v57 = vadd.f32 %v1281_v51, %v465_v49  ;;  %v1330_v10 = vadd.f32 %v1322_v52, %v538_v54  ;;  %v1333_v28 = vmul.f32 0.5, %v1329_v27  ;;  %v2912_v49 = vld [vmem:[#allocation13 + $0x88] ss:$16 sps:$4 sm:$0xff]   ;;  %v2915_v50 = vld [vmem:[#allocation13 + $0x64] ss:$16 sps:$4 sm:$0xff]  }
 0x529   :  { %v1283_v58 = vpop.f32.mrf.mxu0  ;;  %v1324_v59 = vpop.f32.mrf.mxu1  ;;  %v2918_v51 = vld [vmem:[#allocation13 + $0x6c] ss:$16 sps:$4 sm:$0xff]   ;;  %v2921_v52 = vld [vmem:[#allocation13 + $0x60] ss:$16 sps:$4 sm:$0xff]   ;;  %v2927_v54 = vld [vmem:[#allocation13 + $0x44] ss:$16 sps:$4 sm:$0xff]  }
 0x52a   :  { %2105 = vtanh.f32 %v1331_v56  ;;  %v1332_v31 = vmul.f32 0.5, %v1328_v57  ;;  %v2930_v56 = vld [vmem:[#allocation13 + $0x4c] ss:$16 sps:$4 sm:$0xff]   ;;  %v214_v27 = vld [vmem:[#allocation15 + $0xb0] sm:$0xff] }
 0x52b   :  { %v1284_v25 = vpop.f32.mrf.mxu0  ;;  %v1325_v4 = vpop.f32.mrf.mxu1  ;;  %v215_v57 = vld [vmem:[#allocation15 + $0xb8] sm:$0xff] }
 0x52c   :  { %2107 = vtanh.f32 %v1332_v31 }
 0x52d   :  { %2109 = vtanh.f32 %v1330_v10  ;;  %v3057_v10 = vld [vmem:[#allocation37_spill] sm:$0xff] }
 0x52e   :  { %2111 = vtanh.f32 %v1333_v28  ;;  %v3058_v28 = vld [vmem:[#allocation35_spill] sm:$0xff] }
 0x537   :  { %v2106_v29 = vpop.eup %2105 }
 0x538   :  { %v1337_v16 = vmul.f32 0.5, %v2106_v29  ;;  %v540_v29 = vadd.f32 %v3058_v28, %v214_v27 }
 0x539   :  { %v2108_v14 = vpop.eup %2107 }
 0x53a   :  { %v1340_v9 = vadd.f32 0.5, %v1337_v16  ;;  %v1338_v37 = vmul.f32 0.5, %v2108_v14  ;;  %v2110_v46 = vpop.eup %2109 }
 0x53b   :  { %v2112_v30 = vpop.eup %2111 }
 0x53c   :  { %v1341_v17 = vadd.f32 0.5, %v1338_v37  ;;  %v1345_v55 = vmul.f32 %v2110_v46, %v1340_v9  ;;  %v1339_v32 = vmul.f32 0.5, %v2112_v30 }
 0x53e   :  { %v1344_v0 = vmul.f32 %v1341_v17, %v2812_v26  ;;  %v1342_v33 = vadd.f32 0.5, %v1339_v32 }
 0x540   :  { %v1346_v11 = vadd.f32 %v1345_v55, %v1344_v0 }
 0x542   :  { %2113 = vtanh.f32 %v1346_v11  ;;  %v2864_v12 = vsel %vm1350_vm8, %v1346_v11, %v2812_v26  ;;  %v2874_v26 = vld [vmem:[#allocation13 + $0xe8] ss:$16 sps:$4 sm:$0xff]  }
 0x54f   :  { %v2114_v18 = vpop.eup %2113 }
 0x550   :  { %v1348_v15 = vmul.f32 %v2114_v18, %v1342_v33 }
 0x552   :  { %v1352_v13 = vpack.c.bf16 %v1348_v15, %v1348_v15 }
 0x554   :  { %v2867_v20 = vsel %vm1353_vm9, %v1352_v13, %v2815_v1  ;;  %v2885_v1 = vld [vmem:[#allocation13 + $0xc0] ss:$16 sps:$4 sm:$0xff]  }
 0x555   :  { %1393 = vmatmul.mubr.bf16.vlgmr.msra.gmra.mxu0 %v2867_v20  ;;  %1434 = vmatmul.mubr.bf16.vlgmr.msra.gmra.mxu1 %v2867_v20 }
 0x556   :  { %1476 = vmatpush1.bf16.msra.mxu0 %v2871_v23  ;;  %1517 = vmatpush1.bf16.msra.mxu1 %v2874_v26 }
 0x557   :  { %1477 = vmatprep.subr.bf16.mxu0 %v2877_v22  ;;  %1518 = vmatprep.subr.bf16.mxu1 %v2880_v19 }
 0x558   :  { %1507 = vmatprep.mubr.bf16.mxu0 %v3044_v34  ;;  %1548 = vmatprep.mubr.bf16.mxu1 %v3044_v34 }
 0x55a   :  { %1478 = vmatpush1.bf16.msra.mxu0 %v2885_v1  ;;  %1519 = vmatpush1.bf16.msra.mxu1 %v2888_v40 }
 0x55b   :  { %1479 = vmatprep.subr.bf16.mxu0 %v2891_v41  ;;  %1520 = vmatprep.subr.bf16.mxu1 %v2894_v42 }
 0x55e   :  { %1480 = vmatpush1.bf16.msra.mxu0 %v2897_v43  ;;  %1521 = vmatpush1.bf16.msra.mxu1 %v2900_v44 }
 0x55f   :  { %1481 = vmatprep.subr.bf16.mxu0 %v2903_v45  ;;  %1522 = vmatprep.subr.bf16.mxu1 %v2906_v47 }
 0x562   :  { %1482 = vmatpush1.bf16.msra.mxu0 %v2909_v48  ;;  %1523 = vmatpush1.bf16.msra.mxu1 %v2912_v49 }
 0x563   :  { %1483 = vmatprep.subr.bf16.mxu0 %v2915_v50  ;;  %1524 = vmatprep.subr.bf16.mxu1 %v2918_v51 }
 0x566   :  { %1484 = vmatpush1.bf16.msra.mxu0 %v2921_v52  ;;  %1525 = vmatpush1.bf16.msra.mxu1 %v2924_v53 }
 0x567   :  { %1485 = vmatprep.subr.bf16.mxu0 %v2927_v54  ;;  %1526 = vmatprep.subr.bf16.mxu1 %v2930_v56 }
 0x56a   :  { %1486 = vmatpush1.bf16.msra.mxu0 %v2524_v60  ;;  %1527 = vmatpush1.bf16.msra.mxu1 %v2526_v61  ;;  %v212_v60 = vld [vmem:[#allocation15 + $0xa0] sm:$0xff]  ;;  %v213_v61 = vld [vmem:[#allocation15 + $0xa8] sm:$0xff] }
 0x56b   :  { %1487 = vmatprep.subr.bf16.mxu0 %v2530_v62  ;;  %1528 = vmatprep.subr.bf16.mxu1 %v2532_v63  ;;  %v3055_v62 = vld [vmem:[#allocation34_spill] sm:$0xff] }
 0x56c   :  { %v467_v63 = vadd.f32 %v3055_v62, %v212_v60 }
 0x56e   :  { %1488 = vmatpush1.bf16.msra.mxu0 %v2538_v2  ;;  %1529 = vmatpush1.bf16.msra.mxu1 %v2540_v3  ;;  %v3056_v3 = vld [vmem:[#allocation36_spill] sm:$0xff] }
 0x56f   :  { %1489 = vmatprep.subr.bf16.mxu0 %v2544_v5  ;;  %1530 = vmatprep.subr.bf16.mxu1 %v2546_v6  ;;  %v469_v59 = vadd.f32 %v3056_v3, %v213_v61 }
 0x572   :  { %1490 = vmatpush1.bf16.msra.mxu0 %v2550_v7  ;;  %1531 = vmatpush1.bf16.msra.mxu1 %v2552_v8  ;;  %v542_v7 = vadd.f32 %v3057_v10, %v215_v57 }
 0x573   :  { %1590 = vmatprep.subr.bf16.mxu0 %v2851_v38  ;;  %1631 = vmatprep.subr.bf16.mxu1 %v2854_v39 }
 0x615   :  { %v1394_v2 = vpop.f32.mrf.mxu0  ;;  %v1435_v58 = vpop.f32.mrf.mxu1 }
 0x616   :  { %v1442_v5 = vadd.f32 %v1394_v2, %v467_v63  ;;  %v1444_v16 = vadd.f32 %v1435_v58, %v540_v29 }
 0x617   :  { %v1396_v31 = vpop.f32.mrf.mxu0  ;;  %v1437_v6 = vpop.f32.mrf.mxu1 }
 0x618   :  { %v1446_v25 = vmul.f32 0.5, %v1442_v5  ;;  %v1443_v8 = vadd.f32 %v1396_v31, %v469_v59  ;;  %v1445_v35 = vadd.f32 %v1437_v6, %v542_v7  ;;  %v1448_v14 = vmul.f32 0.5, %v1444_v16 }
 0x619   :  { %v1398_v4 = vpop.f32.mrf.mxu0  ;;  %v1439_v38 = vpop.f32.mrf.mxu1 }
 0x61a   :  { %2115 = vtanh.f32 %v1446_v25  ;;  %v1447_v39 = vmul.f32 0.5, %v1443_v8  ;;  %v218_v25 = vld [vmem:[#allocation15 + $0xd0] sm:$0xff]  ;;  %v3062_v8 = vld [vmem:[#allocation39_spill] sm:$0xff] }
 0x61b   :  { %v1399_v36 = vpop.f32.mrf.mxu0  ;;  %v1440_v21 = vpop.f32.mrf.mxu1  ;;  %v546_v4 = vadd.f32 %v3062_v8, %v218_v25 }
 0x61c   :  { %2117 = vtanh.f32 %v1447_v39 }
 0x61d   :  { %2119 = vtanh.f32 %v1445_v35 }
 0x61e   :  { %2121 = vtanh.f32 %v1448_v14 }
 0x627   :  { %v2116_v9 = vpop.eup %2115 }
 0x628   :  { %v1452_v37 = vmul.f32 0.5, %v2116_v9 }
 0x629   :  { %v2118_v46 = vpop.eup %2117 }
 0x62a   :  { %v1455_v17 = vadd.f32 0.5, %v1452_v37  ;;  %v1453_v55 = vmul.f32 0.5, %v2118_v46  ;;  %v2120_v0 = vpop.eup %2119 }
 0x62b   :  { %v2122_v15 = vpop.eup %2121 }
 0x62c   :  { %v1456_v11 = vadd.f32 0.5, %v1453_v55  ;;  %v1460_v30 = vmul.f32 %v2120_v0, %v1455_v17  ;;  %v1454_v13 = vmul.f32 0.5, %v2122_v15  ;;  %v220_v15 = vld [vmem:[#allocation15 + $0xe0] sm:$0xff] }
 0x62e   :  { %v1459_v32 = vmul.f32 %v1456_v11, %v2864_v12  ;;  %v1457_v60 = vadd.f32 0.5, %v1454_v13  ;;  %v221_v13 = vld [vmem:[#allocation15 + $0xe8] sm:$0xff] }
 0x630   :  { %v1461_v33 = vadd.f32 %v1460_v30, %v1459_v32 }
 0x632   :  { %2123 = vtanh.f32 %v1461_v33  ;;  %v2952_v18 = vsel %vm1465_vm10, %v1461_v33, %v2864_v12  ;;  %v2168_v12 = vld [vmem:[#allocation13 + $0x48] ss:$16 sps:$4 sm:$0xff]  }
 0x63f   :  { %v2124_v61 = vpop.eup %2123 }
 0x640   :  { %v1463_v62 = vmul.f32 %v2124_v61, %v1457_v60  ;;  %v3063_v60 = vld [vmem:[#allocation42_spill] sm:$0xff] }
 0x641   :  { %v477_v61 = vadd.f32 %v3063_v60, %v220_v15 }
 0x642   :  { %v1467_v63 = vpack.c.bf16 %v1463_v62, %v1463_v62 }
 0x644   :  { %v2955_v57 = vsel %vm1468_vm11, %v1467_v63, %v2867_v20  ;;  %v2169_v20 = vld [vmem:[#allocation13 + $0x24] ss:$16 sps:$4 sm:$0xff]  }
 0x645   :  { %1508 = vmatmul.mubr.bf16.vlgmr.msra.gmra.mxu0 %v2955_v57  ;;  %1549 = vmatmul.mubr.bf16.vlgmr.msra.gmra.mxu1 %v2955_v57 }
 0x646   :  { %1591 = vmatpush1.bf16.msra.mxu0 %v2871_v23  ;;  %1632 = vmatpush1.bf16.msra.mxu1 %v2874_v26  ;;  %v2170_v23 = vld [vmem:[#allocation13 + $0x2c] ss:$16 sps:$4 sm:$0xff]   ;;  %v2171_v26 = vld [vmem:[#allocation13 + $0x20] ss:$16 sps:$4 sm:$0xff]  }
 0x647   :  { %1592 = vmatprep.subr.bf16.mxu0 %v2877_v22  ;;  %1633 = vmatprep.subr.bf16.mxu1 %v2880_v19  ;;  %v2172_v22 = vld [vmem:[#allocation13 + $0x28] ss:$16 sps:$4 sm:$0xff]   ;;  %v2173_v19 = vld [vmem:[#allocation13 + $0x4] ss:$16 sps:$4 sm:$0xff]  }
 0x648   :  { %1622 = vmatprep.mubr.bf16.mxu0 %v3044_v34  ;;  %1663 = vmatprep.mubr.bf16.mxu1 %v3044_v34  ;;  %v2167_v34 = vld [vmem:[#allocation13 + $0x40] ss:$16 sps:$4 sm:$0xff]  }
 0x64a   :  { %1593 = vmatpush1.bf16.msra.mxu0 %v2885_v1  ;;  %1634 = vmatpush1.bf16.msra.mxu1 %v2888_v40  ;;  %v2174_v1 = vld [vmem:[#allocation13 + $0xc] ss:$16 sps:$4 sm:$0xff]   ;;  %v2175_v40 = vld [vmem:[#allocation13] ss:$16 sps:$4 sm:$0xff]  }
 0x64b   :  { %1594 = vmatprep.subr.bf16.mxu0 %v2891_v41  ;;  %1635 = vmatprep.subr.bf16.mxu1 %v2894_v42  ;;  %v2176_v41 = vld [vmem:[#allocation13 + $0x8] ss:$16 sps:$4 sm:$0xff]   ;;  %v216_v42 = vld [vmem:[#allocation15 + $0xc0] sm:$0xff] }
 0x64e   :  { %1595 = vmatpush1.bf16.msra.mxu0 %v2897_v43  ;;  %1636 = vmatpush1.bf16.msra.mxu1 %v2900_v44  ;;  %v217_v43 = vld [vmem:[#allocation15 + $0xc8] sm:$0xff]  ;;  %v3059_v44 = vld [vmem:[#allocation38_spill] sm:$0xff] }
 0x64f   :  { %1596 = vmatprep.subr.bf16.mxu0 %v2903_v45  ;;  %1637 = vmatprep.subr.bf16.mxu1 %v2906_v47  ;;  %v473_v45 = vadd.f32 %v3059_v44, %v216_v42  ;;  %v219_v47 = vld [vmem:[#allocation15 + $0xd8] sm:$0xff] }
 0x652   :  { %1597 = vmatpush1.bf16.msra.mxu0 %v2909_v48  ;;  %1638 = vmatpush1.bf16.msra.mxu1 %v2912_v49 }
 0x653   :  { %1598 = vmatprep.subr.bf16.mxu0 %v2915_v50  ;;  %1639 = vmatprep.subr.bf16.mxu1 %v2918_v51  ;;  %v3060_v50 = vld [vmem:[#allocation40_spill] sm:$0xff] }
 0x654   :  { %v475_v51 = vadd.f32 %v3060_v50, %v217_v43 }
 0x656   :  { %1599 = vmatpush1.bf16.msra.mxu0 %v2921_v52  ;;  %1640 = vmatpush1.bf16.msra.mxu1 %v2924_v53 }
 0x657   :  { %1600 = vmatprep.subr.bf16.mxu0 %v2927_v54  ;;  %1641 = vmatprep.subr.bf16.mxu1 %v2930_v56  ;;  %v3061_v56 = vld [vmem:[#allocation41_spill] sm:$0xff] }
 0x658   :  { %v548_v2 = vadd.f32 %v3061_v56, %v219_v47  ;;  %v3066_v47 = vld [vmem:[#allocation43_spill] sm:$0xff] }
 0x65a   :  { %1601 = vmatpush1.bf16.msra.mxu0 %v2167_v34  ;;  %1642 = vmatpush1.bf16.msra.mxu1 %v2168_v12  ;;  %v3064_v34 = vld [vmem:[#allocation44_spill] sm:$0xff] }
 0x65b   :  { %1602 = vmatprep.subr.bf16.mxu0 %v2169_v20  ;;  %1643 = vmatprep.subr.bf16.mxu1 %v2170_v23 }
 0x65e   :  { %1603 = vmatpush1.bf16.msra.mxu0 %v2171_v26  ;;  %1644 = vmatpush1.bf16.msra.mxu1 %v2172_v22  ;;  %v3065_v26 = vld [vmem:[#allocation45_spill] sm:$0xff] }
 0x65f   :  { %1604 = vmatprep.subr.bf16.mxu0 %v2173_v19  ;;  %1645 = vmatprep.subr.bf16.mxu1 %v2174_v1  ;;  %v552_v22 = vadd.f32 %v3065_v26, %v223_v24 }
 0x662   :  { %1605 = vmatpush1.bf16.msra.mxu0 %v2175_v40  ;;  %1646 = vmatpush1.bf16.msra.mxu1 %v2176_v41 }
 0x705   :  { %v1509_v48 = vpop.f32.mrf.mxu0  ;;  %v1550_v49 = vpop.f32.mrf.mxu1 }
 0x706   :  { %v1557_v52 = vadd.f32 %v1509_v48, %v473_v45  ;;  %v1559_v38 = vadd.f32 %v1550_v49, %v546_v4  ;;  %v222_v45 = vld [vmem:[#allocation15 + $0xf0] sm:$0xff] }
 0x707   :  { %v1511_v53 = vpop.f32.mrf.mxu0  ;;  %v1552_v54 = vpop.f32.mrf.mxu1  ;;  %v550_v48 = vadd.f32 %v3066_v47, %v222_v45 }
 0x708   :  { %v1561_v58 = vmul.f32 0.5, %v1557_v52  ;;  %v1558_v3 = vadd.f32 %v1511_v53, %v475_v51  ;;  %v1560_v6 = vadd.f32 %v1552_v54, %v548_v2  ;;  %v1563_v39 = vmul.f32 0.5, %v1559_v38 }
 0x709   :  { %v1513_v59 = vpop.f32.mrf.mxu0  ;;  %v1554_v5 = vpop.f32.mrf.mxu1 }
 0x70a   :  { %2125 = vtanh.f32 %v1561_v58  ;;  %v1562_v31 = vmul.f32 0.5, %v1558_v3  ;;  %v2177_v5 = vld [vmem:[#allocation10] sm:$0xff] }
 0x70b   :  { %v1514_v10 = vpop.f32.mrf.mxu0  ;;  %v1555_v7 = vpop.f32.mrf.mxu1  ;;  %vm1695_vm14 = vcmp.gt.s32.totalorder %v2177_v5, 7 }
 0x70c   :  { %2127 = vtanh.f32 %v1562_v31  ;;  %vm1698_vm15 = vmpackc.low %vm1695_vm14, %vm1695_vm14 }
 0x70d   :  { %2129 = vtanh.f32 %v1560_v6 }
 0x70e   :  { %2131 = vtanh.f32 %v1563_v39 }
 0x717   :  { %v2126_v35 = vpop.eup %2125 }
 0x718   :  { %v1567_v36 = vmul.f32 0.5, %v2126_v35 }
 0x719   :  { %v2128_v21 = vpop.eup %2127 }
 0x71a   :  { %v1570_v27 = vadd.f32 0.5, %v1567_v36  ;;  %v1568_v28 = vmul.f32 0.5, %v2128_v21  ;;  %v2130_v29 = vpop.eup %2129 }
 0x71b   :  { %v2132_v17 = vpop.eup %2131 }
 0x71c   :  { %v1571_v16 = vadd.f32 0.5, %v1568_v28  ;;  %v1575_v14 = vmul.f32 %v2130_v29, %v1570_v27  ;;  %v1569_v55 = vmul.f32 0.5, %v2132_v17 }
 0x71e   :  { %v1574_v9 = vmul.f32 %v1571_v16, %v2952_v18  ;;  %v1572_v0 = vadd.f32 0.5, %v1569_v55 }
 0x720   :  { %v1576_v37 = vadd.f32 %v1575_v14, %v1574_v9 }
 0x722   :  { %2133 = vtanh.f32 %v1576_v37  ;;  %v1581_v46 = vsel %vm1580_vm12, %v1576_v37, %v2952_v18  ;;  %v479_v18 = vadd.f32 %v3064_v34, %v221_v13 }
 0x72f   :  { %v2134_v11 = vpop.eup %2133 }
 0x730   :  { %v1578_v30 = vmul.f32 %v2134_v11, %v1572_v0 }
 0x732   :  { %v1582_v32 = vpack.c.bf16 %v1578_v30, %v1578_v30 }
 0x734   :  { %v1584_v33 = vsel %vm1583_vm13, %v1582_v32, %v2955_v57 }
 0x735   :  { %1623 = vmatmul.mubr.bf16.vlgmr.msra.gmra.mxu0 %v1584_v33  ;;  %1664 = vmatmul.mubr.bf16.vlgmr.msra.gmra.mxu1 %v1584_v33 }
 0x7f5   :  { %v1624_v62 = vpop.f32.mrf.mxu0  ;;  %v1665_v63 = vpop.f32.mrf.mxu1 }
 0x7f6   :  { %v1672_v12 = vadd.f32 %v1624_v62, %v477_v61  ;;  %v1674_v49 = vadd.f32 %v1665_v63, %v550_v48 }
 0x7f7   :  { %v1626_v20 = vpop.f32.mrf.mxu0  ;;  %v1667_v23 = vpop.f32.mrf.mxu1 }
 0x7f8   :  { %v1676_v19 = vmul.f32 0.5, %v1672_v12  ;;  %v1673_v1 = vadd.f32 %v1626_v20, %v479_v18  ;;  %v1675_v42 = vadd.f32 %v1667_v23, %v552_v22  ;;  %v1678_v50 = vmul.f32 0.5, %v1674_v49 }
 0x7f9   :  { %v1628_v40 = vpop.f32.mrf.mxu0  ;;  %v1669_v57 = vpop.f32.mrf.mxu1 }
 0x7fa   :  { %2135 = vtanh.f32 %v1676_v19  ;;  %v1677_v41 = vmul.f32 0.5, %v1673_v1 }
 0x7fb   :  { %v1629_v43 = vpop.f32.mrf.mxu0  ;;  %v1670_v44 = vpop.f32.mrf.mxu1 }
 0x7fc   :  { %2137 = vtanh.f32 %v1677_v41 }
 0x7fd   :  { %2139 = vtanh.f32 %v1675_v42 }
 0x7fe   :  { %2141 = vtanh.f32 %v1678_v50 }
 0x807   :  { %v2136_v51 = vpop.eup %2135 }
 0x808   :  { %v1682_v52 = vmul.f32 0.5, %v2136_v51 }
 0x809   :  { %v2138_v53 = vpop.eup %2137 }
 0x80a   :  { %v1685_v54 = vadd.f32 0.5, %v1682_v52  ;;  %v1683_v56 = vmul.f32 0.5, %v2138_v53  ;;  %v2140_v2 = vpop.eup %2139 }
 0x80b   :  { %v2142_v10 = vpop.eup %2141 }
 0x80c   :  { %v1686_v58 = vadd.f32 0.5, %v1683_v56  ;;  %v1690_v3 = vmul.f32 %v2140_v2, %v1685_v54  ;;  %v1684_v7 = vmul.f32 0.5, %v2142_v10 }
 0x80e   :  { %v1689_v59 = vmul.f32 %v1686_v58, %v1581_v46  ;;  %v1687_v25 = vadd.f32 0.5, %v1684_v7 }
 0x810   :  { %v1691_v31 = vadd.f32 %v1690_v3, %v1689_v59 }
 0x812   :  { %2143 = vtanh.f32 %v1691_v31  ;;  %v1696_v6 = vsel %vm1695_vm14, %v1691_v31, %v1581_v46 }
 0x813   :  { %1701 = vst [vmem:[#allocation3] sm:$0xff] %v1696_v6 }
 0x81f   :  { %v2144_v8 = vpop.eup %2143 }
 0x820   :  { %v1693_v4 = vmul.f32 %v2144_v8, %v1687_v25 }
 0x822   :  { %v1697_v38 = vpack.c.bf16 %v1693_v4, %v1693_v4 }
 0x824   :  { %v1699_v39 = vsel %vm1698_vm15, %v1697_v38, %v1584_v33 }
 0x825   :  { %1700 = vst [vmem:[#allocation2] sm:$0xf] %v1699_v39 }
 0x826 PF:  { %v3067_v35 = vmov 0.0   ;;  %v2178_v36 = vld [vmem:[#allocation16 + $0x38] sm:$0xff]   ;;  %vm2353_vm0 = vmmov 0   ;;  %v2179_v21 = vld [vmem:[#allocation16 + $0x30] sm:$0xff]   ;;  %v2180_v27 = vld [vmem:[#allocation16 + $0x28] sm:$0xff]   ;;  %s2354_s9 = smov [#allocation18]  }
 0x827   :  { %1928 = vmatprep.subr.bf16.mxu0 %v3067_v35  ;;  %1944 = vmatprep.mubr.msk.bf16.mxu0 %vm2353_vm0, %v3067_v35  ;;  %v2181_v28 = vld [vmem:[#allocation16 + $0x20] sm:$0xff]   ;;  %v2182_v29 = vld [vmem:[#allocation16 + $0x18] sm:$0xff]   ;;  %v2183_v16 = vld [vmem:[#allocation16 + $0x10] sm:$0xff]   ;;  %s1818_s10 = sshll.u32 %s2354_s9, 4  ;;  %s1819_s10 = int_to_ptr.vmem [resolvable:$true] %s1818_s10 }
 0x828   :  { %1929 = vmatpush3.bf16.msra.mxu0 %v2178_v36  ;;  %v2184_v14 = vld [vmem:[#allocation16 + $0x8] sm:$0xff]   ;;  %v2185_v9 = vld [vmem:[#allocation16] sm:$0xff]   ;;  %s2308_s11 = scalar_lea.vmem %s1819_s10, 128  ;;  %p2313_p11 = scmp.lt.s32.totalorder %s1819_s10, %s1819_s10 }
 0x829   :  { %1930 = vmatprep.subr.bf16.mxu0 %v3067_v35  ;;  %v1722_v46 = vld [vmem:[%s3015_s7] sm:$0xff]  ;;  %p2309_p10 = scmp.ne.s32.totalorder %s1819_s10, %s2308_s11  ;;  %p2314_p12 = scmp.lt.s32.totalorder %s2308_s11, %s2308_s11 }
 0x82b   :  { %p2315_p13 = por %p2314_p12, %p2313_p11 }
 0x82c   :  { %1931 = vmatpush3.bf16.msra.mxu0 %v2179_v21  ;;  %v1705_v37 = vld [vmem:[#allocation2] sm:$0xf] }
 0x82d   :  { %1932 = vmatprep.subr.bf16.mxu0 %v3067_v35  ;;  %p2316_p0 = pnand %p2315_p13, %p2309_p10 }
 0x830   :  { %1933 = vmatpush3.bf16.msra.mxu0 %v2180_v27 }
 0x831   :  { %1934 = vmatprep.subr.bf16.mxu0 %v3067_v35 }
 0x834   :  { %1935 = vmatpush3.bf16.msra.mxu0 %v2181_v28 }
 0x835   :  { %1936 = vmatprep.subr.bf16.mxu0 %v3067_v35 }
 0x838   :  { %1937 = vmatpush3.bf16.msra.mxu0 %v2182_v29 }
 0x839   :  { %1938 = vmatprep.subr.bf16.mxu0 %v3067_v35 }
 0x83c   :  { %1939 = vmatpush3.bf16.msra.mxu0 %v2183_v16 }
 0x83d   :  { %1940 = vmatprep.subr.bf16.mxu0 %v3067_v35 }
 0x840   :  { %1941 = vmatpush3.bf16.msra.mxu0 %v2184_v14 }
 0x841   :  { %1942 = vmatprep.subr.bf16.mxu0 %v3067_v35 }
 0x844   :  { %1943 = vmatpush3.bf16.msra.mxu0 %v2185_v9 }
 0x847   :  { %1945 = vmatmul.mubr.bf16.vlgmr.msra.gmra.mxu0 %v1705_v37 }
 0x907   :  { %v1805_v17 = vpop.f32.mrf.mxu0 }
 0x908   :  { %v1806_v55 = vadd.f32 %v1805_v17, %v1722_v46 }
 0x909   :  { %v1946_v0 = vpop.f32.mrf.mxu0 }
 0x90a   :  { %1811 = vst [vmem:[#allocation18] sm:$0xff] %v1806_v55 }
 0x90b   :  { %v1808_v11 = vpop.f32.mrf.mxu0 }
 0x90c   :  { %2319 = shalt.err (!%p2316_p0)
}
 0x90d   :  { %1821 = dma.vmem_to_hbm [thread:$0]  %s1819_s10, 128, %s3016_s8, [#allocation9]   ;;  %v1947_v30 = vpop.f32.mrf.mxu0 }
 0x90e   :  { %2336 = dma.done.wait [#allocation9], 128  }
 0x90f   :  { %2337 = vsyncadd [#allocation9], 4294967168 }
 0x910   :  { %1825 = vsyncpa [#allocation8], 1 }
 0x911   :  { %1826 = vsyncpa [#allocation11], 1 }
 0x912   :  { %1827 = vsyncpa [#allocation14], 1 }
 0x913   :  { %1828 = vsyncpa [#allocation17], 1 }
 0x914   :  { %1829 = vsyncpa [#allocation9], 1 }

</bundles_post_ra>
